<compile_context>
chip_gen: v7x
topology: tpu7x:2x2x1
jax: 0.10.0
libtpu: 0.0.40
codegen_flags: <defaults>
</compile_context>

<pallas_src>
import jax
import jax.numpy as jnp
from jax.experimental import pallas as pl
from jax.experimental.pallas import tpu as pltpu


def lstm_kernel(x_ref, wih_ref, whh_ref, b_ref, h0_ref, c0_ref,
                h_out_ref, c_out_ref, gx_ref):
    T, Nb, I = x_ref.shape
    _, H = h0_ref.shape

    # ---- Prologue: one large bf16 input projection on the MXU -------------------
    # gates_x = X @ W_ih^T   (g-gate columns of W_ih already pre-scaled by 2).
    # Collapsing (T, Nb) -> T*Nb keeps the lane dim untouched and Nb is a multiple of
    # the sublane tile, so this reshape is layout-preserving.
    xb = x_ref[...].reshape(T * Nb, I).astype(jnp.bfloat16)
    gx = jnp.dot(xb, wih_ref[...], preferred_element_type=jnp.float32)
    gx_ref[...] = gx.astype(jnp.bfloat16)            # bf16 scratch: half the VMEM

    b = b_ref[...]                                    # (1, 4H) f32, hoisted out of the loop

    # ---- Serial recurrence over time, fully inside the kernel --------------------
    def step(t, carry):
        h, c = carry                                  # f32 (Nb, H)
        off = pl.multiple_of(t * Nb, Nb)
        gx_t = gx_ref[pl.ds(off, Nb), :].astype(jnp.float32)
        gates = gx_t + b + jnp.dot(h.astype(jnp.bfloat16), whh_ref[...],
                                   preferred_element_type=jnp.float32)

        # Single sigmoid pass over all 4 gates; g recovered via tanh(z) = 2*sig(2z) - 1.
        s = jax.nn.sigmoid(gates)
        i_g = s[:, 0 * H:1 * H]
        f_g = s[:, 1 * H:2 * H]
        g_g = 2.0 * s[:, 2 * H:3 * H] - 1.0
        o_g = s[:, 3 * H:4 * H]

        c_new = f_g * c + i_g * g_g
        h_new = o_g * jnp.tanh(c_new)
        return h_new, c_new

    h0 = h0_ref[...].astype(jnp.float32)
    c0 = c0_ref[...].astype(jnp.float32)

    # Cap unrolling once the live gate slab per step gets big (vreg pressure).
    gate_vregs = max(1, (max(Nb, 8) // 8) * max(1, (4 * H) // 128))
    unroll = True if (T <= 8 and gate_vregs <= 8) else min(4, T)
    h_f, c_f = jax.lax.fori_loop(0, T, step, (h0, c0), unroll=unroll)

    h_out_ref[...] = h_f.astype(h_out_ref.dtype)
    c_out_ref[...] = c_f.astype(c_out_ref.dtype)


def lstm_forward(x, hidden_state, w_ih, w_hh, b_ih, b_hh):
    """Mirrors LSTM.forward: returns (h_final, (h_final, c_final)).

    x is (N, I) for one step or (T*N, I) for T unrolled steps (same heuristic as the
    PyTorch module: single-step iff x.shape[0] == hidden batch N).
    """
    h0, c0 = hidden_state
    N, H = h0.shape
    TN, I = x.shape
    T = 1 if TN == N else TN // N
    assert T * N == TN, "x rows must be N or T*N"
    # NOTE: throughput scales ~linearly with N (MXU M-fill) at no extra step count;
    # batch independent sequences toward N=128+ at production scale.

    # Pre-transpose weights to (I, 4H)/(H, 4H) in bf16 (MXU-native; f32 accumulate in the
    # kernel) and pre-scale g-gate columns by 2 so one sigmoid serves all four gates.
    scale = jnp.concatenate([
        jnp.ones((2 * H,), jnp.float32),
        jnp.full((H,), 2.0, jnp.float32),
        jnp.ones((H,), jnp.float32),
    ])
    wih_t = (w_ih.T * scale[None, :]).astype(jnp.bfloat16)       # (I, 4H)
    whh_t = (w_hh.T * scale[None, :]).astype(jnp.bfloat16)       # (H, 4H)
    b = ((b_ih + b_hh) * scale)[None, :].astype(jnp.float32)     # (1, 4H)

    x3 = x.reshape(T, N, I).astype(jnp.float32)                  # time-major (T, N, I)

    # Split the batch across a "parallel" grid axis once it is big enough: on v7x the two
    # TensorCores each run an independent half of the batch (no cross-core traffic); on
    # single-core parts the extra grid step is negligible.
    # TODO(synk): switch to pltpu.CORE_PARALLEL / pl.core_map for explicit per-core
    # placement on v7x at production batch sizes.
    num_splits = 2 if (N >= 16 and N % 16 == 0) else 1
    Nb = N // num_splits

    bf16, f32 = 2, 4
    per_split = (f32 * T * Nb * I                        # x block
                 + bf16 * (I * 4 * H + H * 4 * H)        # bf16 weights
                 + f32 * 4 * H                           # bias
                 + f32 * 4 * Nb * H                      # h0/c0/h_out/c_out blocks
                 + bf16 * T * Nb * 4 * H)                # gates_x scratch (bf16)
    vmem_need = 2 * per_split + (1 << 20)                # double buffers + headroom
    try:
        vmem_cap = int(pltpu.get_tpu_info().vmem_capacity_bytes)
    except Exception:
        vmem_cap = 64 << 20                              # v7x-safe fallback
    vmem_limit = int(min(max(vmem_need, 16 << 20), vmem_cap - (8 << 20)))

    cost = pl.CostEstimate(
        flops=2 * T * N * 4 * H * (I + H),
        transcendentals=5 * T * N * H,
        bytes_accessed=(f32 * T * N * I + bf16 * (I * 4 * H + H * 4 * H)
                        + f32 * 4 * H + f32 * 4 * N * H),
    )

    in_specs = [
        pl.BlockSpec((T, Nb, I), lambda s: (0, s, 0)),   # x (time-major)
        pl.BlockSpec((I, 4 * H), lambda s: (0, 0)),      # W_ih^T (bf16, shared)
        pl.BlockSpec((H, 4 * H), lambda s: (0, 0)),      # W_hh^T (bf16, shared)
        pl.BlockSpec((1, 4 * H), lambda s: (0, 0)),      # bias (f32, shared)
        pl.BlockSpec((Nb, H), lambda s: (s, 0)),         # h0
        pl.BlockSpec((Nb, H), lambda s: (s, 0)),         # c0
    ]
    out_specs = (pl.BlockSpec((Nb, H), lambda s: (s, 0)),
                 pl.BlockSpec((Nb, H), lambda s: (s, 0)))

    # NOTE: input_output_aliases={4: 0, 5: 1} would drop two small output buffers but
    # donates h0/c0, which callers (and this demo) reuse after the call; omitted.
    h_f, c_f = pl.pallas_call(
        lstm_kernel,
        grid=(num_splits,),
        out_shape=(jax.ShapeDtypeStruct((N, H), h0.dtype),
                   jax.ShapeDtypeStruct((N, H), h0.dtype)),
        in_specs=in_specs,
        out_specs=out_specs,
        scratch_shapes=[pltpu.VMEM((T * Nb, 4 * H), jnp.bfloat16)],
        compiler_params=pltpu.CompilerParams(
            dimension_semantics=(pltpu.PARALLEL,),
            vmem_limit_bytes=vmem_limit),
        cost_estimate=cost,
    )(x3, wih_t, whh_t, b, h0, c0)

    return h_f, (h_f, c_f)


def lstm_reference(x, hidden_state, w_ih, w_hh, b_ih, b_hh):
    """Pure-JAX f32 reference replicating torch.nn.LSTMCell semantics."""
    h, c = hidden_state
    N, H = h.shape
    xs = x[None] if x.shape[0] == N else x.reshape(x.shape[0] // N, N, x.shape[1])
    for t in range(xs.shape[0]):
        gates = xs[t] @ w_ih.T + b_ih + h @ w_hh.T + b_hh
        i = jax.nn.sigmoid(gates[:, 0 * H:1 * H])
        f = jax.nn.sigmoid(gates[:, 1 * H:2 * H])
        g = jnp.tanh(gates[:, 2 * H:3 * H])
        o = jax.nn.sigmoid(gates[:, 3 * H:4 * H])
        c = f * c + i * g
        h = o * jnp.tanh(c)
    return h, (h, c)


def orthogonal_like(key, shape):
    """Deterministic orthogonal init, matching nn.init.orthogonal_ semantics."""
    rows, cols = shape
    a = jax.random.normal(key, (max(rows, cols), min(rows, cols)), jnp.float32)
    q, r = jnp.linalg.qr(a)
    q = q * jnp.sign(jnp.diag(r))[None, :]
    return q if rows >= cols else q.T


if __name__ == "__main__":
    input_size = 32
    hid_size = 128   # module default; keeps every gate slice lane-aligned (128 lanes)
    N = 32           # batch >= 16 so the 2-way batch-split grid axis is exercised
    T = 8            # time steps -> x batch = T * N

    key = jax.random.PRNGKey(0)
    k_wih, k_whh, k_x, k_h, k_c = jax.random.split(key, 5)

    # LSTMCell parameters: weight_ih (4H, I), weight_hh (4H, H), biases zero.
    w_ih = orthogonal_like(k_wih, (4 * hid_size, input_size)).astype(jnp.float32)
    w_hh = orthogonal_like(k_whh, (4 * hid_size, hid_size)).astype(jnp.float32)
    b_ih = jnp.zeros((4 * hid_size,), jnp.float32)
    b_hh = jnp.zeros((4 * hid_size,), jnp.float32)

    x = jax.random.normal(k_x, (T * N, input_size), jnp.float32)
    h0 = jax.random.normal(k_h, (N, hid_size), jnp.float32)
    c0 = jax.random.normal(k_c, (N, hid_size), jnp.float32)

    # bf16 MXU operands (f32 accumulate) -> compare vs. the f32 reference with
    # bf16-appropriate tolerances (errors accumulate over the T-step recurrence).
    TOL = dict(atol=5e-2, rtol=5e-2)

    # Multi-step path (T*N rows of x, N rows of hidden state).
    out_h, (hs_h, hs_c) = lstm_forward(x, (h0, c0), w_ih, w_hh, b_ih, b_hh)
    jax.block_until_ready((out_h, hs_h, hs_c))
    ref_h, (_, ref_c) = lstm_reference(x, (h0, c0), w_ih, w_hh, b_ih, b_hh)
    assert out_h.shape == (N, hid_size) and hs_c.shape == (N, hid_size)
    assert jnp.allclose(out_h, ref_h, **TOL)
    assert jnp.allclose(hs_c, ref_c, **TOL)

    # Single-step path (x batch == hidden batch).
    x1 = x[:N]
    out1_h, (hs1_h, hs1_c) = lstm_forward(x1, (h0, c0), w_ih, w_hh, b_ih, b_hh)
    jax.block_until_ready((out1_h, hs1_h, hs1_c))
    ref1_h, (_, ref1_c) = lstm_reference(x1, (h0, c0), w_ih, w_hh, b_ih, b_hh)
    assert jnp.allclose(out1_h, ref1_h, **TOL)
    assert jnp.allclose(hs1_c, ref1_c, **TOL)

    print("KERNEL_OK")
</pallas_src>

<mosaic_0001>
module attributes {stable_mosaic.version = 11 : i64} {
  func.func @lstm_kernel(%arg0: i32, %arg1: memref<8x16x32xf32, #tpu.memory_space<vmem>>, %arg2: memref<32x512xbf16, #tpu.memory_space<vmem>>, %arg3: memref<128x512xbf16, #tpu.memory_space<vmem>>, %arg4: memref<1x512xf32, #tpu.memory_space<vmem>>, %arg5: memref<16x128xf32, #tpu.memory_space<vmem>>, %arg6: memref<16x128xf32, #tpu.memory_space<vmem>>, %arg7: memref<16x128xf32, #tpu.memory_space<vmem>>, %arg8: memref<16x128xf32, #tpu.memory_space<vmem>>, %arg9: memref<128x512xbf16, #tpu.memory_space<vmem>>) attributes {dimension_semantics = [#tpu.dimension_semantics<parallel>], iteration_bounds = array<i64: 2>, scalar_prefetch = 0 : i64, scratch_operands = 1 : i64, tpu.core_type = #tpu.core_type<tc>, window_params = [{transform_indices = @transform_0, window_bounds = array<i64: 8, 16, 32>}, {pipeline_mode = #tpu.pipeline_mode<synchronous>, transform_indices = @transform_1, window_bounds = array<i64: 32, 512>}, {pipeline_mode = #tpu.pipeline_mode<synchronous>, transform_indices = @transform_2, window_bounds = array<i64: 128, 512>}, {pipeline_mode = #tpu.pipeline_mode<synchronous>, transform_indices = @transform_3, window_bounds = array<i64: 1, 512>}, {transform_indices = @transform_4, window_bounds = array<i64: 16, 128>}, {transform_indices = @transform_5, window_bounds = array<i64: 16, 128>}, {transform_indices = @transform_6, window_bounds = array<i64: 16, 128>}, {transform_indices = @transform_7, window_bounds = array<i64: 16, 128>}]} {
    %c0 = arith.constant 0 : index
    %c0_0 = arith.constant 0 : index
    %c0_1 = arith.constant 0 : index
    %0 = vector.load %arg1[%c0, %c0_0, %c0_1] : memref<8x16x32xf32, #tpu.memory_space<vmem>>, vector<8x16x32xf32>
    %1 = vector.shape_cast %0 : vector<8x16x32xf32> to vector<128x32xf32>
    %2 = arith.truncf %1 : vector<128x32xf32> to vector<128x32xbf16>
    %c0_2 = arith.constant 0 : index
    %c0_3 = arith.constant 0 : index
    %3 = vector.load %arg2[%c0_2, %c0_3] : memref<32x512xbf16, #tpu.memory_space<vmem>>, vector<32x512xbf16>
    %cst = arith.constant dense<0.000000e+00> : vector<128x512xf32>
    %4 = tpu.matmul %2, %3, %cst {dimension_numbers = #tpu.dot_dimension_numbers<[1], [0], [0], [1], [0, 0, 1, 1], [], []>} : vector<128x32xbf16>, vector<32x512xbf16>, vector<128x512xf32> -> vector<128x512xf32>
    %5 = arith.truncf %4 : vector<128x512xf32> to vector<128x512xbf16>
    %c0_4 = arith.constant 0 : index
    %c0_5 = arith.constant 0 : index
    %6 = vector.load %arg9[%c0_4, %c0_5] : memref<128x512xbf16, #tpu.memory_space<vmem>>, vector<128x512xbf16>
    tpu.vector_store %arg9[%c0_4, %c0_5], %5 {strides = array<i32>} : memref<128x512xbf16, #tpu.memory_space<vmem>>, vector<128x512xbf16>,
    %c0_6 = arith.constant 0 : index
    %c0_7 = arith.constant 0 : index
    %7 = vector.load %arg4[%c0_6, %c0_7] : memref<1x512xf32, #tpu.memory_space<vmem>>, vector<1x512xf32>
    %c0_8 = arith.constant 0 : index
    %c0_9 = arith.constant 0 : index
    %8 = vector.load %arg5[%c0_8, %c0_9] : memref<16x128xf32, #tpu.memory_space<vmem>>, vector<16x128xf32>
    %c0_10 = arith.constant 0 : index
    %c0_11 = arith.constant 0 : index
    %9 = vector.load %arg6[%c0_10, %c0_11] : memref<16x128xf32, #tpu.memory_space<vmem>>, vector<16x128xf32>
    %c0_i32 = arith.constant 0 : i32
    %c16_i32 = arith.constant 16 : i32
    %10 = arith.muli %c0_i32, %c16_i32 : i32
    %11 = tpu.assume_multiple %10, 16 : i32
    %12 = arith.index_cast %11 : i32 to index
    %c0_12 = arith.constant 0 : index
    %13 = vector.load %arg9[%12, %c0_12] : memref<128x512xbf16, #tpu.memory_space<vmem>>, vector<16x512xbf16>
    %14 = arith.extf %13 : vector<16x512xbf16> to vector<16x512xf32>
    %15 = vector.broadcast %7 : vector<1x512xf32> to vector<16x512xf32>
    %16 = arith.addf %14, %15 : vector<16x512xf32>
    %17 = arith.truncf %8 : vector<16x128xf32> to vector<16x128xbf16>
    %c0_13 = arith.constant 0 : index
    %c0_14 = arith.constant 0 : index
    %18 = vector.load %arg3[%c0_13, %c0_14] : memref<128x512xbf16, #tpu.memory_space<vmem>>, vector<128x512xbf16>
    %cst_15 = arith.constant dense<0.000000e+00> : vector<16x512xf32>
    %19 = tpu.matmul %17, %18, %cst_15 {dimension_numbers = #tpu.dot_dimension_numbers<[1], [0], [0], [1], [0, 0, 1, 1], [], []>} : vector<16x128xbf16>, vector<128x512xbf16>, vector<16x512xf32> -> vector<16x512xf32>
    %20 = arith.addf %16, %19 : vector<16x512xf32>
    %21 = arith.negf %20 : vector<16x512xf32>
    %22 = math.exp %21 : vector<16x512xf32>
    %cst_16 = arith.constant 1.000000e+00 : f32
    %23 = vector.broadcast %cst_16 : f32 to vector<16x512xf32>
    %24 = arith.addf %23, %22 : vector<16x512xf32>
    %25 = arith.divf %23, %24 : vector<16x512xf32>
    %26 = vector.extract_strided_slice %25 {offsets = [0, 0], sizes = [16, 128], strides = [1, 1]} : vector<16x512xf32> to vector<16x128xf32>
    %27 = vector.extract_strided_slice %25 {offsets = [0, 128], sizes = [16, 128], strides = [1, 1]} : vector<16x512xf32> to vector<16x128xf32>
    %28 = vector.extract_strided_slice %25 {offsets = [0, 256], sizes = [16, 128], strides = [1, 1]} : vector<16x512xf32> to vector<16x128xf32>
    %cst_17 = arith.constant 2.000000e+00 : f32
    %29 = vector.broadcast %cst_17 : f32 to vector<16x128xf32>
    %30 = arith.mulf %29, %28 : vector<16x128xf32>
    %cst_18 = arith.constant 1.000000e+00 : f32
    %31 = vector.broadcast %cst_18 : f32 to vector<16x128xf32>
    %32 = arith.subf %30, %31 : vector<16x128xf32>
    %33 = vector.extract_strided_slice %25 {offsets = [0, 384], sizes = [16, 128], strides = [1, 1]} : vector<16x512xf32> to vector<16x128xf32>
    %34 = arith.mulf %27, %9 : vector<16x128xf32>
    %35 = arith.mulf %26, %32 : vector<16x128xf32>
    %36 = arith.addf %34, %35 : vector<16x128xf32>
    %37 = math.tanh %36 : vector<16x128xf32>
    %38 = arith.mulf %33, %37 : vector<16x128xf32>
    %c1_i32 = arith.constant 1 : i32
    %c16_i32_19 = arith.constant 16 : i32
    %39 = arith.muli %c1_i32, %c16_i32_19 : i32
    %40 = tpu.assume_multiple %39, 16 : i32
    %41 = arith.index_cast %40 : i32 to index
    %c0_20 = arith.constant 0 : index
    %42 = vector.load %arg9[%41, %c0_20] : memref<128x512xbf16, #tpu.memory_space<vmem>>, vector<16x512xbf16>
    %43 = arith.extf %42 : vector<16x512xbf16> to vector<16x512xf32>
    %44 = vector.broadcast %7 : vector<1x512xf32> to vector<16x512xf32>
    %45 = arith.addf %43, %44 : vector<16x512xf32>
    %46 = arith.truncf %38 : vector<16x128xf32> to vector<16x128xbf16>
    %c0_21 = arith.constant 0 : index
    %c0_22 = arith.constant 0 : index
    %47 = vector.load %arg3[%c0_21, %c0_22] : memref<128x512xbf16, #tpu.memory_space<vmem>>, vector<128x512xbf16>
    %cst_23 = arith.constant dense<0.000000e+00> : vector<16x512xf32>
    %48 = tpu.matmul %46, %47, %cst_23 {dimension_numbers = #tpu.dot_dimension_numbers<[1], [0], [0], [1], [0, 0, 1, 1], [], []>} : vector<16x128xbf16>, vector<128x512xbf16>, vector<16x512xf32> -> vector<16x512xf32>
    %49 = arith.addf %45, %48 : vector<16x512xf32>
    %50 = arith.negf %49 : vector<16x512xf32>
    %51 = math.exp %50 : vector<16x512xf32>
    %cst_24 = arith.constant 1.000000e+00 : f32
    %52 = vector.broadcast %cst_24 : f32 to vector<16x512xf32>
    %53 = arith.addf %52, %51 : vector<16x512xf32>
    %54 = arith.divf %52, %53 : vector<16x512xf32>
    %55 = vector.extract_strided_slice %54 {offsets = [0, 0], sizes = [16, 128], strides = [1, 1]} : vector<16x512xf32> to vector<16x128xf32>
    %56 = vector.extract_strided_slice %54 {offsets = [0, 128], sizes = [16, 128], strides = [1, 1]} : vector<16x512xf32> to vector<16x128xf32>
    %57 = vector.extract_strided_slice %54 {offsets = [0, 256], sizes = [16, 128], strides = [1, 1]} : vector<16x512xf32> to vector<16x128xf32>
    %cst_25 = arith.constant 2.000000e+00 : f32
    %58 = vector.broadcast %cst_25 : f32 to vector<16x128xf32>
    %59 = arith.mulf %58, %57 : vector<16x128xf32>
    %cst_26 = arith.constant 1.000000e+00 : f32
    %60 = vector.broadcast %cst_26 : f32 to vector<16x128xf32>
    %61 = arith.subf %59, %60 : vector<16x128xf32>
    %62 = vector.extract_strided_slice %54 {offsets = [0, 384], sizes = [16, 128], strides = [1, 1]} : vector<16x512xf32> to vector<16x128xf32>
    %63 = arith.mulf %56, %36 : vector<16x128xf32>
    %64 = arith.mulf %55, %61 : vector<16x128xf32>
    %65 = arith.addf %63, %64 : vector<16x128xf32>
    %66 = math.tanh %65 : vector<16x128xf32>
    %67 = arith.mulf %62, %66 : vector<16x128xf32>
    %c2_i32 = arith.constant 2 : i32
    %c16_i32_27 = arith.constant 16 : i32
    %68 = arith.muli %c2_i32, %c16_i32_27 : i32
    %69 = tpu.assume_multiple %68, 16 : i32
    %70 = arith.index_cast %69 : i32 to index
    %c0_28 = arith.constant 0 : index
    %71 = vector.load %arg9[%70, %c0_28] : memref<128x512xbf16, #tpu.memory_space<vmem>>, vector<16x512xbf16>
    %72 = arith.extf %71 : vector<16x512xbf16> to vector<16x512xf32>
    %73 = vector.broadcast %7 : vector<1x512xf32> to vector<16x512xf32>
    %74 = arith.addf %72, %73 : vector<16x512xf32>
    %75 = arith.truncf %67 : vector<16x128xf32> to vector<16x128xbf16>
    %c0_29 = arith.constant 0 : index
    %c0_30 = arith.constant 0 : index
    %76 = vector.load %arg3[%c0_29, %c0_30] : memref<128x512xbf16, #tpu.memory_space<vmem>>, vector<128x512xbf16>
    %cst_31 = arith.constant dense<0.000000e+00> : vector<16x512xf32>
    %77 = tpu.matmul %75, %76, %cst_31 {dimension_numbers = #tpu.dot_dimension_numbers<[1], [0], [0], [1], [0, 0, 1, 1], [], []>} : vector<16x128xbf16>, vector<128x512xbf16>, vector<16x512xf32> -> vector<16x512xf32>
    %78 = arith.addf %74, %77 : vector<16x512xf32>
    %79 = arith.negf %78 : vector<16x512xf32>
    %80 = math.exp %79 : vector<16x512xf32>
    %cst_32 = arith.constant 1.000000e+00 : f32
    %81 = vector.broadcast %cst_32 : f32 to vector<16x512xf32>
    %82 = arith.addf %81, %80 : vector<16x512xf32>
    %83 = arith.divf %81, %82 : vector<16x512xf32>
    %84 = vector.extract_strided_slice %83 {offsets = [0, 0], sizes = [16, 128], strides = [1, 1]} : vector<16x512xf32> to vector<16x128xf32>
    %85 = vector.extract_strided_slice %83 {offsets = [0, 128], sizes = [16, 128], strides = [1, 1]} : vector<16x512xf32> to vector<16x128xf32>
    %86 = vector.extract_strided_slice %83 {offsets = [0, 256], sizes = [16, 128], strides = [1, 1]} : vector<16x512xf32> to vector<16x128xf32>
    %cst_33 = arith.constant 2.000000e+00 : f32
    %87 = vector.broadcast %cst_33 : f32 to vector<16x128xf32>
    %88 = arith.mulf %87, %86 : vector<16x128xf32>
    %cst_34 = arith.constant 1.000000e+00 : f32
    %89 = vector.broadcast %cst_34 : f32 to vector<16x128xf32>
    %90 = arith.subf %88, %89 : vector<16x128xf32>
    %91 = vector.extract_strided_slice %83 {offsets = [0, 384], sizes = [16, 128], strides = [1, 1]} : vector<16x512xf32> to vector<16x128xf32>
    %92 = arith.mulf %85, %65 : vector<16x128xf32>
    %93 = arith.mulf %84, %90 : vector<16x128xf32>
    %94 = arith.addf %92, %93 : vector<16x128xf32>
    %95 = math.tanh %94 : vector<16x128xf32>
    %96 = arith.mulf %91, %95 : vector<16x128xf32>
    %c3_i32 = arith.constant 3 : i32
    %c16_i32_35 = arith.constant 16 : i32
    %97 = arith.muli %c3_i32, %c16_i32_35 : i32
    %98 = tpu.assume_multiple %97, 16 : i32
    %99 = arith.index_cast %98 : i32 to index
    %c0_36 = arith.constant 0 : index
    %100 = vector.load %arg9[%99, %c0_36] : memref<128x512xbf16, #tpu.memory_space<vmem>>, vector<16x512xbf16>
    %101 = arith.extf %100 : vector<16x512xbf16> to vector<16x512xf32>
    %102 = vector.broadcast %7 : vector<1x512xf32> to vector<16x512xf32>
    %103 = arith.addf %101, %102 : vector<16x512xf32>
    %104 = arith.truncf %96 : vector<16x128xf32> to vector<16x128xbf16>
    %c0_37 = arith.constant 0 : index
    %c0_38 = arith.constant 0 : index
    %105 = vector.load %arg3[%c0_37, %c0_38] : memref<128x512xbf16, #tpu.memory_space<vmem>>, vector<128x512xbf16>
    %cst_39 = arith.constant dense<0.000000e+00> : vector<16x512xf32>
    %106 = tpu.matmul %104, %105, %cst_39 {dimension_numbers = #tpu.dot_dimension_numbers<[1], [0], [0], [1], [0, 0, 1, 1], [], []>} : vector<16x128xbf16>, vector<128x512xbf16>, vector<16x512xf32> -> vector<16x512xf32>
    %107 = arith.addf %103, %106 : vector<16x512xf32>
    %108 = arith.negf %107 : vector<16x512xf32>
    %109 = math.exp %108 : vector<16x512xf32>
    %cst_40 = arith.constant 1.000000e+00 : f32
    %110 = vector.broadcast %cst_40 : f32 to vector<16x512xf32>
    %111 = arith.addf %110, %109 : vector<16x512xf32>
    %112 = arith.divf %110, %111 : vector<16x512xf32>
    %113 = vector.extract_strided_slice %112 {offsets = [0, 0], sizes = [16, 128], strides = [1, 1]} : vector<16x512xf32> to vector<16x128xf32>
    %114 = vector.extract_strided_slice %112 {offsets = [0, 128], sizes = [16, 128], strides = [1, 1]} : vector<16x512xf32> to vector<16x128xf32>
    %115 = vector.extract_strided_slice %112 {offsets = [0, 256], sizes = [16, 128], strides = [1, 1]} : vector<16x512xf32> to vector<16x128xf32>
    %cst_41 = arith.constant 2.000000e+00 : f32
    %116 = vector.broadcast %cst_41 : f32 to vector<16x128xf32>
    %117 = arith.mulf %116, %115 : vector<16x128xf32>
    %cst_42 = arith.constant 1.000000e+00 : f32
    %118 = vector.broadcast %cst_42 : f32 to vector<16x128xf32>
    %119 = arith.subf %117, %118 : vector<16x128xf32>
    %120 = vector.extract_strided_slice %112 {offsets = [0, 384], sizes = [16, 128], strides = [1, 1]} : vector<16x512xf32> to vector<16x128xf32>
    %121 = arith.mulf %114, %94 : vector<16x128xf32>
    %122 = arith.mulf %113, %119 : vector<16x128xf32>
    %123 = arith.addf %121, %122 : vector<16x128xf32>
    %124 = math.tanh %123 : vector<16x128xf32>
    %125 = arith.mulf %120, %124 : vector<16x128xf32>
    %c4_i32 = arith.constant 4 : i32
    %c16_i32_43 = arith.constant 16 : i32
    %126 = arith.muli %c4_i32, %c16_i32_43 : i32
    %127 = tpu.assume_multiple %126, 16 : i32
    %128 = arith.index_cast %127 : i32 to index
    %c0_44 = arith.constant 0 : index
    %129 = vector.load %arg9[%128, %c0_44] : memref<128x512xbf16, #tpu.memory_space<vmem>>, vector<16x512xbf16>
    %130 = arith.extf %129 : vector<16x512xbf16> to vector<16x512xf32>
    %131 = vector.broadcast %7 : vector<1x512xf32> to vector<16x512xf32>
    %132 = arith.addf %130, %131 : vector<16x512xf32>
    %133 = arith.truncf %125 : vector<16x128xf32> to vector<16x128xbf16>
    %c0_45 = arith.constant 0 : index
    %c0_46 = arith.constant 0 : index
    %134 = vector.load %arg3[%c0_45, %c0_46] : memref<128x512xbf16, #tpu.memory_space<vmem>>, vector<128x512xbf16>
    %cst_47 = arith.constant dense<0.000000e+00> : vector<16x512xf32>
    %135 = tpu.matmul %133, %134, %cst_47 {dimension_numbers = #tpu.dot_dimension_numbers<[1], [0], [0], [1], [0, 0, 1, 1], [], []>} : vector<16x128xbf16>, vector<128x512xbf16>, vector<16x512xf32> -> vector<16x512xf32>
    %136 = arith.addf %132, %135 : vector<16x512xf32>
    %137 = arith.negf %136 : vector<16x512xf32>
    %138 = math.exp %137 : vector<16x512xf32>
    %cst_48 = arith.constant 1.000000e+00 : f32
    %139 = vector.broadcast %cst_48 : f32 to vector<16x512xf32>
    %140 = arith.addf %139, %138 : vector<16x512xf32>
    %141 = arith.divf %139, %140 : vector<16x512xf32>
    %142 = vector.extract_strided_slice %141 {offsets = [0, 0], sizes = [16, 128], strides = [1, 1]} : vector<16x512xf32> to vector<16x128xf32>
    %143 = vector.extract_strided_slice %141 {offsets = [0, 128], sizes = [16, 128], strides = [1, 1]} : vector<16x512xf32> to vector<16x128xf32>
    %144 = vector.extract_strided_slice %141 {offsets = [0, 256], sizes = [16, 128], strides = [1, 1]} : vector<16x512xf32> to vector<16x128xf32>
    %cst_49 = arith.constant 2.000000e+00 : f32
    %145 = vector.broadcast %cst_49 : f32 to vector<16x128xf32>
    %146 = arith.mulf %145, %144 : vector<16x128xf32>
    %cst_50 = arith.constant 1.000000e+00 : f32
    %147 = vector.broadcast %cst_50 : f32 to vector<16x128xf32>
    %148 = arith.subf %146, %147 : vector<16x128xf32>
    %149 = vector.extract_strided_slice %141 {offsets = [0, 384], sizes = [16, 128], strides = [1, 1]} : vector<16x512xf32> to vector<16x128xf32>
    %150 = arith.mulf %143, %123 : vector<16x128xf32>
    %151 = arith.mulf %142, %148 : vector<16x128xf32>
    %152 = arith.addf %150, %151 : vector<16x128xf32>
    %153 = math.tanh %152 : vector<16x128xf32>
    %154 = arith.mulf %149, %153 : vector<16x128xf32>
    %c5_i32 = arith.constant 5 : i32
    %c16_i32_51 = arith.constant 16 : i32
    %155 = arith.muli %c5_i32, %c16_i32_51 : i32
    %156 = tpu.assume_multiple %155, 16 : i32
    %157 = arith.index_cast %156 : i32 to index
    %c0_52 = arith.constant 0 : index
    %158 = vector.load %arg9[%157, %c0_52] : memref<128x512xbf16, #tpu.memory_space<vmem>>, vector<16x512xbf16>
    %159 = arith.extf %158 : vector<16x512xbf16> to vector<16x512xf32>
    %160 = vector.broadcast %7 : vector<1x512xf32> to vector<16x512xf32>
    %161 = arith.addf %159, %160 : vector<16x512xf32>
    %162 = arith.truncf %154 : vector<16x128xf32> to vector<16x128xbf16>
    %c0_53 = arith.constant 0 : index
    %c0_54 = arith.constant 0 : index
    %163 = vector.load %arg3[%c0_53, %c0_54] : memref<128x512xbf16, #tpu.memory_space<vmem>>, vector<128x512xbf16>
    %cst_55 = arith.constant dense<0.000000e+00> : vector<16x512xf32>
    %164 = tpu.matmul %162, %163, %cst_55 {dimension_numbers = #tpu.dot_dimension_numbers<[1], [0], [0], [1], [0, 0, 1, 1], [], []>} : vector<16x128xbf16>, vector<128x512xbf16>, vector<16x512xf32> -> vector<16x512xf32>
    %165 = arith.addf %161, %164 : vector<16x512xf32>
    %166 = arith.negf %165 : vector<16x512xf32>
    %167 = math.exp %166 : vector<16x512xf32>
    %cst_56 = arith.constant 1.000000e+00 : f32
    %168 = vector.broadcast %cst_56 : f32 to vector<16x512xf32>
    %169 = arith.addf %168, %167 : vector<16x512xf32>
    %170 = arith.divf %168, %169 : vector<16x512xf32>
    %171 = vector.extract_strided_slice %170 {offsets = [0, 0], sizes = [16, 128], strides = [1, 1]} : vector<16x512xf32> to vector<16x128xf32>
    %172 = vector.extract_strided_slice %170 {offsets = [0, 128], sizes = [16, 128], strides = [1, 1]} : vector<16x512xf32> to vector<16x128xf32>
    %173 = vector.extract_strided_slice %170 {offsets = [0, 256], sizes = [16, 128], strides = [1, 1]} : vector<16x512xf32> to vector<16x128xf32>
    %cst_57 = arith.constant 2.000000e+00 : f32
    %174 = vector.broadcast %cst_57 : f32 to vector<16x128xf32>
    %175 = arith.mulf %174, %173 : vector<16x128xf32>
    %cst_58 = arith.constant 1.000000e+00 : f32
    %176 = vector.broadcast %cst_58 : f32 to vector<16x128xf32>
    %177 = arith.subf %175, %176 : vector<16x128xf32>
    %178 = vector.extract_strided_slice %170 {offsets = [0, 384], sizes = [16, 128], strides = [1, 1]} : vector<16x512xf32> to vector<16x128xf32>
    %179 = arith.mulf %172, %152 : vector<16x128xf32>
    %180 = arith.mulf %171, %177 : vector<16x128xf32>
    %181 = arith.addf %179, %180 : vector<16x128xf32>
    %182 = math.tanh %181 : vector<16x128xf32>
    %183 = arith.mulf %178, %182 : vector<16x128xf32>
    %c6_i32 = arith.constant 6 : i32
    %c16_i32_59 = arith.constant 16 : i32
    %184 = arith.muli %c6_i32, %c16_i32_59 : i32
    %185 = tpu.assume_multiple %184, 16 : i32
    %186 = arith.index_cast %185 : i32 to index
    %c0_60 = arith.constant 0 : index
    %187 = vector.load %arg9[%186, %c0_60] : memref<128x512xbf16, #tpu.memory_space<vmem>>, vector<16x512xbf16>
    %188 = arith.extf %187 : vector<16x512xbf16> to vector<16x512xf32>
    %189 = vector.broadcast %7 : vector<1x512xf32> to vector<16x512xf32>
    %190 = arith.addf %188, %189 : vector<16x512xf32>
    %191 = arith.truncf %183 : vector<16x128xf32> to vector<16x128xbf16>
    %c0_61 = arith.constant 0 : index
    %c0_62 = arith.constant 0 : index
    %192 = vector.load %arg3[%c0_61, %c0_62] : memref<128x512xbf16, #tpu.memory_space<vmem>>, vector<128x512xbf16>
    %cst_63 = arith.constant dense<0.000000e+00> : vector<16x512xf32>
    %193 = tpu.matmul %191, %192, %cst_63 {dimension_numbers = #tpu.dot_dimension_numbers<[1], [0], [0], [1], [0, 0, 1, 1], [], []>} : vector<16x128xbf16>, vector<128x512xbf16>, vector<16x512xf32> -> vector<16x512xf32>
    %194 = arith.addf %190, %193 : vector<16x512xf32>
    %195 = arith.negf %194 : vector<16x512xf32>
    %196 = math.exp %195 : vector<16x512xf32>
    %cst_64 = arith.constant 1.000000e+00 : f32
    %197 = vector.broadcast %cst_64 : f32 to vector<16x512xf32>
    %198 = arith.addf %197, %196 : vector<16x512xf32>
    %199 = arith.divf %197, %198 : vector<16x512xf32>
    %200 = vector.extract_strided_slice %199 {offsets = [0, 0], sizes = [16, 128], strides = [1, 1]} : vector<16x512xf32> to vector<16x128xf32>
    %201 = vector.extract_strided_slice %199 {offsets = [0, 128], sizes = [16, 128], strides = [1, 1]} : vector<16x512xf32> to vector<16x128xf32>
    %202 = vector.extract_strided_slice %199 {offsets = [0, 256], sizes = [16, 128], strides = [1, 1]} : vector<16x512xf32> to vector<16x128xf32>
    %cst_65 = arith.constant 2.000000e+00 : f32
    %203 = vector.broadcast %cst_65 : f32 to vector<16x128xf32>
    %204 = arith.mulf %203, %202 : vector<16x128xf32>
    %cst_66 = arith.constant 1.000000e+00 : f32
    %205 = vector.broadcast %cst_66 : f32 to vector<16x128xf32>
    %206 = arith.subf %204, %205 : vector<16x128xf32>
    %207 = vector.extract_strided_slice %199 {offsets = [0, 384], sizes = [16, 128], strides = [1, 1]} : vector<16x512xf32> to vector<16x128xf32>
    %208 = arith.mulf %201, %181 : vector<16x128xf32>
    %209 = arith.mulf %200, %206 : vector<16x128xf32>
    %210 = arith.addf %208, %209 : vector<16x128xf32>
    %211 = math.tanh %210 : vector<16x128xf32>
    %212 = arith.mulf %207, %211 : vector<16x128xf32>
    %c7_i32 = arith.constant 7 : i32
    %c16_i32_67 = arith.constant 16 : i32
    %213 = arith.muli %c7_i32, %c16_i32_67 : i32
    %214 = tpu.assume_multiple %213, 16 : i32
    %215 = arith.index_cast %214 : i32 to index
    %c0_68 = arith.constant 0 : index
    %216 = vector.load %arg9[%215, %c0_68] : memref<128x512xbf16, #tpu.memory_space<vmem>>, vector<16x512xbf16>
    %217 = arith.extf %216 : vector<16x512xbf16> to vector<16x512xf32>
    %218 = vector.broadcast %7 : vector<1x512xf32> to vector<16x512xf32>
    %219 = arith.addf %217, %218 : vector<16x512xf32>
    %220 = arith.truncf %212 : vector<16x128xf32> to vector<16x128xbf16>
    %c0_69 = arith.constant 0 : index
    %c0_70 = arith.constant 0 : index
    %221 = vector.load %arg3[%c0_69, %c0_70] : memref<128x512xbf16, #tpu.memory_space<vmem>>, vector<128x512xbf16>
    %cst_71 = arith.constant dense<0.000000e+00> : vector<16x512xf32>
    %222 = tpu.matmul %220, %221, %cst_71 {dimension_numbers = #tpu.dot_dimension_numbers<[1], [0], [0], [1], [0, 0, 1, 1], [], []>} : vector<16x128xbf16>, vector<128x512xbf16>, vector<16x512xf32> -> vector<16x512xf32>
    %223 = arith.addf %219, %222 : vector<16x512xf32>
    %224 = arith.negf %223 : vector<16x512xf32>
    %225 = math.exp %224 : vector<16x512xf32>
    %cst_72 = arith.constant 1.000000e+00 : f32
    %226 = vector.broadcast %cst_72 : f32 to vector<16x512xf32>
    %227 = arith.addf %226, %225 : vector<16x512xf32>
    %228 = arith.divf %226, %227 : vector<16x512xf32>
    %229 = vector.extract_strided_slice %228 {offsets = [0, 0], sizes = [16, 128], strides = [1, 1]} : vector<16x512xf32> to vector<16x128xf32>
    %230 = vector.extract_strided_slice %228 {offsets = [0, 128], sizes = [16, 128], strides = [1, 1]} : vector<16x512xf32> to vector<16x128xf32>
    %231 = vector.extract_strided_slice %228 {offsets = [0, 256], sizes = [16, 128], strides = [1, 1]} : vector<16x512xf32> to vector<16x128xf32>
    %cst_73 = arith.constant 2.000000e+00 : f32
    %232 = vector.broadcast %cst_73 : f32 to vector<16x128xf32>
    %233 = arith.mulf %232, %231 : vector<16x128xf32>
    %cst_74 = arith.constant 1.000000e+00 : f32
    %234 = vector.broadcast %cst_74 : f32 to vector<16x128xf32>
    %235 = arith.subf %233, %234 : vector<16x128xf32>
    %236 = vector.extract_strided_slice %228 {offsets = [0, 384], sizes = [16, 128], strides = [1, 1]} : vector<16x512xf32> to vector<16x128xf32>
    %237 = arith.mulf %230, %210 : vector<16x128xf32>
    %238 = arith.mulf %229, %235 : vector<16x128xf32>
    %239 = arith.addf %237, %238 : vector<16x128xf32>
    %240 = math.tanh %239 : vector<16x128xf32>
    %241 = arith.mulf %236, %240 : vector<16x128xf32>
    %c8_i32 = arith.constant 8 : i32
    %c0_75 = arith.constant 0 : index
    %c0_76 = arith.constant 0 : index
    %242 = vector.load %arg7[%c0_75, %c0_76] : memref<16x128xf32, #tpu.memory_space<vmem>>, vector<16x128xf32>
    tpu.vector_store %arg7[%c0_75, %c0_76], %241 {strides = array<i32>} : memref<16x128xf32, #tpu.memory_space<vmem>>, vector<16x128xf32>,
    %c0_77 = arith.constant 0 : index
    %c0_78 = arith.constant 0 : index
    %243 = vector.load %arg8[%c0_77, %c0_78] : memref<16x128xf32, #tpu.memory_space<vmem>>, vector<16x128xf32>
    tpu.vector_store %arg8[%c0_77, %c0_78], %239 {strides = array<i32>} : memref<16x128xf32, #tpu.memory_space<vmem>>, vector<16x128xf32>,
    return
  }
  func.func @transform_0(%arg0: i32) -> (i32, i32, i32) {
    %c0_i32 = arith.constant 0 : i32
    %c0_i32_0 = arith.constant 0 : i32
    %c0_i32_1 = arith.constant 0 : i32
    return %c0_i32, %arg0, %c0_i32_0 : i32, i32, i32
  }
  func.func @transform_1(%arg0: i32) -> (i32, i32) {
    %c0_i32 = arith.constant 0 : i32
    %c0_i32_0 = arith.constant 0 : i32
    %c0_i32_1 = arith.constant 0 : i32
    return %c0_i32, %c0_i32_0 : i32, i32
  }
  func.func @transform_2(%arg0: i32) -> (i32, i32) {
    %c0_i32 = arith.constant 0 : i32
    %c0_i32_0 = arith.constant 0 : i32
    %c0_i32_1 = arith.constant 0 : i32
    return %c0_i32, %c0_i32_0 : i32, i32
  }
  func.func @transform_3(%arg0: i32) -> (i32, i32) {
    %c0_i32 = arith.constant 0 : i32
    %c0_i32_0 = arith.constant 0 : i32
    %c0_i32_1 = arith.constant 0 : i32
    return %c0_i32, %c0_i32_0 : i32, i32
  }
  func.func @transform_4(%arg0: i32) -> (i32, i32) {
    %c0_i32 = arith.constant 0 : i32
    %c0_i32_0 = arith.constant 0 : i32
    return %arg0, %c0_i32 : i32, i32
  }
  func.func @transform_5(%arg0: i32) -> (i32, i32) {
    %c0_i32 = arith.constant 0 : i32
    %c0_i32_0 = arith.constant 0 : i32
    return %arg0, %c0_i32 : i32, i32
  }
  func.func @transform_6(%arg0: i32) -> (i32, i32) {
    %c0_i32 = arith.constant 0 : i32
    %c0_i32_0 = arith.constant 0 : i32
    return %arg0, %c0_i32 : i32, i32
  }
  func.func @transform_7(%arg0: i32) -> (i32, i32) {
    %c0_i32 = arith.constant 0 : i32
    %c0_i32_0 = arith.constant 0 : i32
    return %arg0, %c0_i32 : i32, i32
  }
}

</mosaic_0001>

<bundles_post_ra>
// kernel: tpu_custom_call.1
= control target key start
LH: loop header
LB: loop body
LE: loop exit
PB: predicated region body
PF: predicated region fallthrough
CT: control target
= control target key end

     0   :  { %s4739_s0 = inlined_call_operand.hbm [shape: f32[8,32,32], index: 0, kind: input, shape index: {}]   ;;  %s4740_s1 = inlined_call_operand.hbm [shape: bf16[32,512], index: 1, kind: input, shape index: {}]   ;;  %s4741_s2 = inlined_call_operand.hbm [shape: bf16[128,512], index: 2, kind: input, shape index: {}]   ;;  %s4742_s3 = inlined_call_operand.vmem [shape: f32[1,512], index: 3, kind: input, shape index: {}]   ;;  %s4743_s4 = inlined_call_operand.hbm [shape: f32[32,128], index: 4, kind: input, shape index: {}]   ;;  %s4744_s5 = inlined_call_operand.hbm [shape: f32[32,128], index: 5, kind: input, shape index: {}]   ;;  %s4745_s6 = inlined_call_operand.hbm [shape: f32[32,128], index: 6, kind: output, shape index: {0}]   ;;  %s4746_s7 = inlined_call_operand.hbm [shape: f32[32,128], index: 7, kind: output, shape index: {1}]  }
   0x1   :  { %4757 = sst [smem:[#allocation79_spill]] %s4739_s0 }
   0x2   :  { %13 = vsyncpa [#allocation4], 0 }
   0x3   :  { %15 = vsyncpa [#allocation4 + $0x1], 0 }
   0x4   :  { %16 = vsyncpa [#allocation7], 0 }
   0x5   :  { %17 = vsyncpa [#allocation10], 0 }
   0x6   :  { %19 = vsyncpa [#allocation10 + $0x1], 0 }
   0x7   :  { %20 = vsyncpa [#allocation5], 0 }
   0x8   :  { %22 = vsyncpa [#allocation5 + $0x1], 0 }
   0x9   :  { %23 = vsyncpa [#allocation14], 0 }
   0xa   :  { %25 = vsyncpa [#allocation14 + $0x1], 0  ;;  %s3626_s24 = smov 0   ;;  %s3628_s25 = smov 0  }
   0xb   :  { %s3630_s26 = smov 0   ;;  %s3632_s27 = smov 0  }
   0xc LB: > { %s3647_s28 = sadd.s32 4294967295, %s3565_s27   ;;  %s2703_s29 = sadd.s32 4294967294, %s3565_s27   ;;  %s3565_s27 = sphi %s3632_s27, %s4883_s27   ;;  %s3561_s26 = sphi %s3630_s26, %s4887_s26   ;;  %s3557_s25 = sphi %s3628_s25, %s4886_s25   ;;  %s3553_s24 = sphi %s3626_s24, %s4885_s24  }
   0xd   : > { %s3651_s30 = sadd.s32 1, %s3565_s27   ;;  %s38_s8 = sadd.s32 1, %s3561_s26 }
   0xe   : > { %4758 = sst [smem:[#allocation23_spill]] %s3651_s30  ;;  %s35_s9 = ssub.s32 %s3565_s27, %s3651_s30 }
   0xf   : > { %p45_p0 = scmp.ne.s32.totalorder %s3561_s26, %s3557_s25  ;;  %p36_p1 = scmp.eq.s32.totalorder %s35_s9, 0 }
  0x10   : > { %p46_p2 = scmp.eq.s32.totalorder %s3565_s27, 0  ;;  %p51_p3 = scmp.ne.s32.totalorder %s3557_s25, %s3553_s24 }
  0x11   : > { %p4747_p4 = scmp.eq.s32.totalorder %s3647_s28, 0  ;;  %p190_p7 = scmp.eq.s32.totalorder %s3647_s28, 1 }
  0x12   : > { %s3663_s10 = scalar_select %p36_p1, %s3561_s26, %s38_s8  }
  0x13   : > { %p3665_p5 = por %p46_p2, %p45_p0  ;;  %p3671_p6 = por %p4747_p4, %p51_p3 }
  0x14   : > { %4759 = sst [smem:[#allocation24_spill]] %s3663_s10  ;;  %p196_p8 = scmp.eq.s32.totalorder %s2703_s29, 1 }
  0x15   : > { %s4760_s11 = scalar_select %p3665_p5, 1, 0 }
  0x16   : > { %s4761_s12 = scalar_select %p3671_p6, 1, 0 }
  0x17   : > { %p2704_p9 = scmp.ge.s32.totalorder %s3565_s27, 1  ;;  %p229_p10 = scmp.lt.s32.totalorder %s3565_s27, 3 }
  0x18   : > { %p3678_p11 = por %p190_p7, %p45_p0  ;;  %p3682_p12 = por %p196_p8, %p51_p3 }
  0x19   : > { %p3686_p13 = pnand %p2704_p9, %p229_p10  ;;  %s3567_s16 = smov [#allocation6]  }
  0x1a   : > { %s4762_s13 = scalar_select %p3678_p11, 1, 0 }
  0x1b   : > { %s4763_s14 = scalar_select %p3682_p12, 1, 0 }
  0x1c   : > { %s4765_s15 = scalar_select %p3686_p13, 1, 0 }
  0x1d   : > { %4764 = sst [smem:[#allocation25_spill]] %s4763_s14  ;;  %p2901_p1 = pneg %p3686_p13 }
  0x1e   : > { %s241_s17 = sshll.u32 %s3567_s16, 4  ;;  %s3568_s19 = smov [#allocation8]   ;;  %s242_s17 = int_to_ptr.vmem [resolvable:$true] %s241_s17 }
  0x1f   : > { %p3694_p2 = pnand %p2901_p1, %p4747_p4  ;;  %s254_s20 = sshll.u32 %s3568_s19, 4  ;;  %s3698_s20 = int_to_ptr.vmem [resolvable:$true] %s254_s20 }
  0x20   : > { %s3347_s23 = scalar_lea.hbm %s4740_s1, 1024 }
  0x21   : > { %p3348_p0 = scmp.ne.s32.totalorder %s4740_s1, %s3347_s23  ;;  %p3349_p3 = pneg %p3694_p2 }
  0x22   : > { %p3354_p9 = scmp.lt.u32.totalorder %s3347_s23, %s4740_s1 }
  0x23   : > { %p3350_p7 = pnand %p3349_p3, %p3348_p0 }
  0x25   : > { %p3351_p8 = pneg %p3350_p7 }
  0x27   : > { %p3356_p10 = pnand %p3354_p9, %p3351_p8 }
  0x29   : > { %3359 = shalt.err (!%p3356_p10)
}
  0x2a   : > { %s3360_s19 = scalar_lea.vmem %s242_s17, 1024  ;;  %p3368_p11 = scmp.lt.s32.totalorder %s242_s17, %s242_s17 }
  0x2b   : > { %p3361_p1 = scmp.ne.s32.totalorder %s242_s17, %s3360_s19  ;;  %p3369_p6 = scmp.lt.s32.totalorder %s3360_s19, %s3360_s19 }
  0x2d   : > { %p3363_p4 = pnand %p3361_p1, %p3349_p3  ;;  %p3370_p13 = por %p3369_p6, %p3368_p11 }
  0x2f   : > { %p3364_p12 = pneg %p3363_p4 }
  0x31   : > { %p3371_p5 = pnand %p3370_p13, %p3364_p12 }
  0x33   : > { %3374 = shalt.err (!%p3371_p5)
}
  0x34   : > { %s3569_s21 = smov 256   ;;  %s3570_s22 = smov 16  }
  0x35   : > { %2904 = dma.hbm_to_vmem [thread:$0]  (!%p3694_p2), %s4740_s1, 1024, %s242_s17, [#allocation7], %s3569_s21, %s3569_s21, %s3570_s22  }
  0x36   : > { %s3375_s16 = scalar_lea.hbm %s4741_s2, 4096 }
  0x37   : > { %p3376_p4 = scmp.ne.s32.totalorder %s4741_s2, %s3375_s16  ;;  %p3382_p11 = scmp.lt.u32.totalorder %s3375_s16, %s4741_s2 }
  0x39   : > { %p3378_p5 = pnand %p3376_p4, %p3349_p3 }
  0x3b   : > { %p3379_p6 = pneg %p3378_p5 }
  0x3d   : > { %p3384_p12 = pnand %p3382_p11, %p3379_p6 }
  0x3f   : > { %3387 = shalt.err (!%p3384_p12)
}
  0x40   : > { %s3388_s17 = scalar_lea.vmem %s3698_s20, 4096  ;;  %p3396_p8 = scmp.lt.s32.totalorder %s3698_s20, %s3698_s20 }
  0x41   : > { %p3389_p13 = scmp.ne.s32.totalorder %s3698_s20, %s3388_s17  ;;  %p3397_p9 = scmp.lt.s32.totalorder %s3388_s17, %s3388_s17 }
  0x43   : > { %p3391_p0 = pnand %p3389_p13, %p3349_p3  ;;  %p3398_p10 = por %p3397_p9, %p3396_p8 }
  0x45   : > { %p3392_p7 = pneg %p3391_p0 }
  0x47   : > { %p3399_p1 = pnand %p3398_p10, %p3392_p7 }
  0x49   : > { %3402 = shalt.err (!%p3399_p1)
}
  0x4a   : > { %2907 = dma.hbm_to_vmem [thread:$0]  (!%p3694_p2), %s4741_s2, 4096, %s3698_s20, [#allocation7], %s3569_s21, %s3569_s21, %s3570_s22  }
  0x4b   : > { %p2707_p4 = scmp.ge.s32.totalorder %s3565_s27, 2 }
  0x4d   : > { %267 = sbr.rel (%p2707_p4) target bundleno = 147 (0x93), region = 28 }
  0x54   : > { %s3751_s14 = sand.u32 1, %s3561_s26   ;;  %s3754_s18 = sshll.u32 %s3565_s27, 8 }
  0x55   : > { %s2708_s20 = sshll.u32 %s3751_s14, 7  ;;  %s4767_s0 = sld [smem:[#allocation79_spill]] }
  0x56   : > { %p4768_p2 = scmp.ne.s32.totalorder %s4760_s11, 0  ;;  %s275_s8 = scalar_lea.vmem [#allocation3], %s2708_s20 }
  0x57   : > { %s294_s9 = sshll.u32 %s275_s8, 4  ;;  %s3571_s19 = smov 512   ;;  %s295_s9 = int_to_ptr.vmem [resolvable:$true] %s294_s9 }
  0x58   : > { %s2880_s29 = scalar_select %p4768_p2, [#allocation0], [#allocation17] }
  0x59   : > { %2881 = sst [smem:[#allocation16]] (%p4768_p2), %s3571_s19  ;;  %s3572_s17 = smov 256  }
  0x5a   : > { %s286_s16 = sld [smem:[%s2880_s29]]   ;;  %s3573_s30 = smov 2  }
  0x5b   : > { %s281_s23 = scalar_lea.hbm %s4767_s0, %s3754_s18  ;;  %2882 = sst [smem:[#allocation16 + $0x1]] (%p4768_p2), %s3572_s17 }
  0x5c   : > { %2883 = sst [smem:[#allocation16 + $0x2]] (%p4768_p2), %s3573_s30  ;;  %s3574_s10 = smov 128  }
  0x5d   : > { %2884 = sst [smem:[#allocation16 + $0x3]] (%p4768_p2), %s3574_s10  ;;  %s3575_s21 = smov 8  }
  0x5e   : > { %2885 = sst [smem:[#allocation16 + $0x4]] (%p4768_p2), %s3574_s10  ;;  %s272_s29 = scalar_lea.sflag [#allocation4], %s3751_s14 }
  0x5f   : > { %2886 = sst [smem:[#allocation16 + $0x5]] (%p4768_p2), %s3575_s21  ;;  %s3576_s8 = smov [#allocation15]  }
  0x60   : > { %s2711_s20 = sshll.u32 %s286_s16, 26  ;;  %s317_s19 = sand.u32 1, %s3565_s27  }
  0x61   : > { %s2712_s22 = sadd.s32 134217728, %s2711_s20  ;;  %s2713_s17 = sshll.u32 %s3751_s14, 4 }
  0x62   : > { %2887 = dma.general (%p4768_p2), %s281_s23, 2048, %s295_s9, %s272_s29, %s3576_s8, [#allocation16], %s2712_s22, 0  }
  0x63   : > { %s3784_s10 = scalar_lea.hbm %s4743_s4, %s3754_s18  ;;  %s321_s16 = scalar_lea.vmem [#allocation9], %s2713_s17 }
  0x64   : > { %s328_s20 = sshll.u32 %s321_s16, 4  ;;  %s3790_s23 = scalar_lea.sflag [#allocation10], %s317_s19  ;;  %s3788_s20 = int_to_ptr.vmem [resolvable:$true] %s328_s20 }
  0x65   : > { %s3403_s9 = scalar_lea.hbm %s3784_s10, 256  ;;  %s3407_s22 = scalar_lea.hbm %s4743_s4, 512 }
  0x66   : > { %p3404_p3 = scmp.ne.s32.totalorder %s3784_s10, %s3403_s9  ;;  %p3408_p11 = scmp.lt.u32.totalorder %s3784_s10, %s4743_s4 }
  0x67   : > { %p3409_p12 = scmp.lt.u32.totalorder %s3407_s22, %s3403_s9  ;;  %p3411_p0 = scmp.lt.u32.totalorder %s3403_s9, %s3784_s10 }
  0x68   : > { %p3405_p5 = pnand %p3404_p3, %p4768_p2 }
  0x69   : > { %p3410_p13 = por %p3409_p12, %p3408_p11 }
  0x6a   : > { %p3406_p6 = pneg %p3405_p5 }
  0x6b   : > { %p3412_p7 = por %p3411_p0, %p3410_p13 }
  0x6d   : > { %p3413_p8 = pnand %p3412_p7, %p3406_p6 }
  0x6f   : > { %3416 = shalt.err (!%p3413_p8)
}
  0x70   : > { %s3417_s19 = scalar_lea.vmem %s3788_s20, 256  ;;  %s3577_s30 = smov [#allocation9]  }
  0x71   : > { %p3418_p9 = scmp.ne.s32.totalorder %s3788_s20, %s3417_s19  ;;  %s3421_s16 = sshll.u32 %s3577_s30, 4  ;;  %s3422_s16 = int_to_ptr.vmem [resolvable:$false] %s3421_s16 }
  0x72   : > { %s3423_s21 = scalar_lea.vmem %s3422_s16, 512  ;;  %p3424_p3 = scmp.lt.s32.totalorder %s3788_s20, %s3422_s16 }
  0x73   : > { %p3419_p10 = pnand %p3418_p9, %p4768_p2  ;;  %p3425_p5 = scmp.lt.s32.totalorder %s3423_s21, %s3417_s19 }
  0x75   : > { %p3420_p1 = pneg %p3419_p10  ;;  %p3426_p11 = por %p3425_p5, %p3424_p3 }
  0x77   : > { %p3427_p12 = pnand %p3426_p11, %p3420_p1 }
  0x79   : > { %3430 = shalt.err (!%p3427_p12)
}
  0x7a   : > { %s3578_s9 = smov 128   ;;  %s3579_s0 = smov 8  }
  0x7b   : > { %2888 = dma.hbm_to_vmem [thread:$0]  (%p4768_p2), %s3784_s10, 256, %s3788_s20, %s3790_s23, %s3578_s9, %s3578_s9, %s3579_s0  }
  0x7c   : > { %s342_s22 = scalar_lea.vmem [#allocation11], %s2713_s17  ;;  %s3823_s30 = scalar_lea.hbm %s4744_s5, %s3754_s18 }
  0x7d   : > { %s349_s29 = sshll.u32 %s342_s22, 4  ;;  %s3431_s16 = scalar_lea.hbm %s3823_s30, 256  ;;  %s3825_s29 = int_to_ptr.vmem [resolvable:$true] %s349_s29 }
  0x7e   : > { %p3432_p6 = scmp.ne.s32.totalorder %s3823_s30, %s3431_s16  ;;  %s3435_s17 = scalar_lea.hbm %s4744_s5, 512 }
  0x7f   : > { %p3436_p7 = scmp.lt.u32.totalorder %s3823_s30, %s4744_s5  ;;  %p3437_p8 = scmp.lt.u32.totalorder %s3435_s17, %s3431_s16 }
  0x80   : > { %p3433_p13 = pnand %p3432_p6, %p4768_p2  ;;  %p3439_p10 = scmp.lt.u32.totalorder %s3431_s16, %s3823_s30 }
  0x81   : > { %p3438_p9 = por %p3437_p8, %p3436_p7 }
  0x82   : > { %p3434_p0 = pneg %p3433_p13 }
  0x83   : > { %p3440_p1 = por %p3439_p10, %p3438_p9 }
  0x85   : > { %p3441_p3 = pnand %p3440_p1, %p3434_p0 }
  0x87   : > { %3444 = shalt.err (!%p3441_p3)
}
  0x88   : > { %s3445_s18 = scalar_lea.vmem %s3825_s29, 256  ;;  %s3580_s22 = smov [#allocation11]  }
  0x89   : > { %p3446_p5 = scmp.ne.s32.totalorder %s3825_s29, %s3445_s18  ;;  %s3449_s8 = sshll.u32 %s3580_s22, 4  ;;  %s3450_s8 = int_to_ptr.vmem [resolvable:$false] %s3449_s8 }
  0x8a   : > { %s3451_s19 = scalar_lea.vmem %s3450_s8, 512  ;;  %p3452_p6 = scmp.lt.s32.totalorder %s3825_s29, %s3450_s8 }
  0x8b   : > { %p3447_p11 = pnand %p3446_p5, %p4768_p2  ;;  %p3453_p13 = scmp.lt.s32.totalorder %s3451_s19, %s3445_s18 }
  0x8d   : > { %p3448_p12 = pneg %p3447_p11  ;;  %p3454_p7 = por %p3453_p13, %p3452_p6 }
  0x8f   : > { %p3455_p8 = pnand %p3454_p7, %p3448_p12 }
  0x91   : > { %3458 = shalt.err (!%p3455_p8)
}
  0x92   : > { %2889 = dma.hbm_to_vmem [thread:$0]  (%p4768_p2), %s3823_s30, 256, %s3825_s29, %s3790_s23, %s3578_s9, %s3578_s9, %s3579_s0  }
  0x93 PF: > { %p4769_p0 = scmp.ne.s32.totalorder %s4765_s15, 0 }
  0x95   : > { %361 = sbr.rel (%p4769_p0) target bundleno = 2408 (0x968), region = 44 }
  0x9c   : > { %s3855_s16 = sand.u32 1, %s3557_s25   ;;  %p4770_p9 = scmp.ne.s32.totalorder %s4761_s12, 0 }
  0x9d   : > { %s2720_s10 = sshll.u32 %s3855_s16, 7  ;;  %s364_s14 = scalar_lea.sflag [#allocation4], %s3855_s16 }
  0x9e   : > { %s3859_s11 = scalar_lea.vmem [#allocation3], %s2720_s10 }
  0x9f   : > { %3532 = dma.done.wait (%p4770_p9), %s364_s14, 2048  }
  0xa0   : > { %3534 = vsyncadd (%p4770_p9), %s364_s14, 4294965248  ;;  %p4771_p2 = scmp.eq.s32.totalorder %s3647_s28, 0 }
  0xa2   : > { %3536 = dma.done.wait (%p4771_p2), [#allocation7], 5120   ;;  %p4772_p10 = pmov %p4771_p2 }
  0xa3   : > { %s380_s15 = sand.u32 1, %s3647_s28   ;;  %s3871_s23 = sshll.u32 %s3855_s16, 4 }
  0xa4   : > { %3538 = vsyncadd (%p4772_p10), [#allocation7], 4294962176  ;;  %s381_s9 = scalar_lea.sflag [#allocation10], %s380_s15  ;;  %s384_s0 = scalar_lea.vmem [#allocation9], %s3871_s23 }
  0xa5   : > { %3540 = dma.done.wait (%p4770_p9), %s381_s9, 512  }
  0xa6   : > { %3542 = vsyncadd (%p4770_p9), %s381_s9, 4294966784  ;;  %v4755_v0 = vmov 0   ;;  %v2967_v1 = vld [vmem:[#allocation6 + $0x4] ss:$16 sps:$4 sm:$0xff]   ;;  %v2969_v2 = vld [vmem:[#allocation6 + $0xc] ss:$16 sps:$4 sm:$0xff]  }
  0xa7   : > { %574 = vmatprep.mubr.bf16.mxu0 %v4755_v0  ;;  %687 = vmatprep.mubr.bf16.mxu1 %v4755_v0  ;;  %v2971_v3 = vld [vmem:[#allocation6] ss:$16 sps:$4 sm:$0xff]   ;;  %v2972_v4 = vld [vmem:[#allocation6 + $0x8] ss:$16 sps:$4 sm:$0xff]   ;;  %v2973_v5 = vld [vmem:[#allocation6 + $0x24] ss:$16 sps:$4 sm:$0xff]  }
  0xa8   : > { %542 = vmatprep.subr.bf16.mxu0 %v2967_v1  ;;  %655 = vmatprep.subr.bf16.mxu1 %v2969_v2  ;;  %v2975_v6 = vld [vmem:[#allocation6 + $0x2c] ss:$16 sps:$4 sm:$0xff]   ;;  %v2977_v7 = vld [vmem:[#allocation6 + $0x20] ss:$16 sps:$4 sm:$0xff]   ;;  %v2978_v8 = vld [vmem:[#allocation6 + $0x28] ss:$16 sps:$4 sm:$0xff]  }
  0xa9   : > { %543 = vmatpush1.bf16.msra.mxu0 %v2971_v3  ;;  %656 = vmatpush1.bf16.msra.mxu1 %v2972_v4  ;;  %v445_v9 = vld [vmem:[%s3859_s11] sm:$0xff]  ;;  %v446_v10 = vld [vmem:[%s3859_s11 + $0x8] sm:$0xff]  ;;  %vm517_vm0 = vcmask 261120   ;;  %v447_v16 = vld [vmem:[%s3859_s11 + $0x10] sm:$0xff]  ;;  %s393_s30 = scalar_lea.vmem [#allocation11], %s3871_s23  ;;  %s2874_s17 = sshll.u32 %s3647_s28, 8 }
  0xaa   : > { %544 = vmatprep.subr.bf16.mxu0 %v2973_v5  ;;  %657 = vmatprep.subr.bf16.mxu1 %v2975_v6  ;;  %v3882_v11 = vld [vmem:[#allocation8 + $0xc] ss:$16 sps:$4 sm:$0xff]   ;;  %v461_v12 = vpack.c.bf16 %v446_v10, %v445_v9  ;;  %v3884_v13 = vld [vmem:[#allocation8 + $0x8] ss:$16 sps:$4 sm:$0xff]   ;;  %v3886_v14 = vld [vmem:[#allocation8 + $0x4] ss:$16 sps:$4 sm:$0xff]   ;;  %v853_v5 = vlaneseq  ;;  %s4653_s8 = scalar_lea.hbm %s4746_s7, %s2874_s17 }
  0xab   : > { %v3888_v15 = vld [vmem:[#allocation8] ss:$16 sps:$4 sm:$0xff]   ;;  %v3893_v17 = vld [vmem:[#allocation8 + $0x2c] ss:$16 sps:$4 sm:$0xff]   ;;  %v3898_v19 = vld [vmem:[#allocation8 + $0x24] ss:$16 sps:$4 sm:$0xff]  }
  0xac   : > { %v448_v18 = vld [vmem:[%s3859_s11 + $0x18] sm:$0xff]  ;;  %v3904_v21 = vld [vmem:[#allocation8 + $0x20] ss:$16 sps:$4 sm:$0xff]   ;;  %v3912_v23 = vld [vmem:[#allocation8 + $0x44] ss:$16 sps:$4 sm:$0xff]   ;;  %s438_s20 = scalar_lea.vmem [#allocation13], %s3871_s23 }
  0xad   : > { %545 = vmatpush1.bf16.msra.mxu0 %v2977_v7  ;;  %658 = vmatpush1.bf16.msra.mxu1 %v2978_v8  ;;  %v3902_v20 = vld [vmem:[#allocation8 + $0x28] ss:$16 sps:$4 sm:$0xff]   ;;  %v3908_v22 = vld [vmem:[#allocation8 + $0x4c] ss:$16 sps:$4 sm:$0xff]   ;;  %v462_v24 = vpack.c.bf16 %v448_v18, %v447_v16  ;;  %v3920_v26 = vld [vmem:[#allocation8 + $0x40] ss:$16 sps:$4 sm:$0xff]  }
  0xae   : > { %1117 = vmatprep.subr.bf16.mxu1 %v3882_v11  ;;  %1074 = vmatprep.subr.bf16.mxu0 %v3886_v14  ;;  %v3916_v25 = vld [vmem:[#allocation8 + $0x48] ss:$16 sps:$4 sm:$0xff]   ;;  %v3922_v27 = vld [vmem:[#allocation8 + $0x6c] ss:$16 sps:$4 sm:$0xff]   ;;  %v3924_v28 = vld [vmem:[#allocation8 + $0x64] ss:$16 sps:$4 sm:$0xff]  }
  0xaf   : > { %v449_v29 = vld [vmem:[%s3859_s11 + $0x20] sm:$0xff]  ;;  %v450_v30 = vld [vmem:[%s3859_s11 + $0x28] sm:$0xff]  ;;  %v451_v40 = vld [vmem:[%s3859_s11 + $0x30] sm:$0xff]  ;;  %s2529_s21 = sshll.u32 %s438_s20, 4  ;;  %s2500_s19 = scalar_lea.sflag [#allocation14], %s3855_s16  ;;  %s4655_s21 = int_to_ptr.vmem [resolvable:$true] %s2529_s21 }
  0xb0   : > { %2735 = vmatmul.mubr.msk.bf16.vlgmr.msra.gmra.mrb[0].mxu0 %vm517_vm0, %v461_v12  ;;  %2743 = vmatmul.mubr.msk.bf16.vlgmr.msra.gmra.mrb[0].mxu1 %vm517_vm0, %v461_v12  ;;  %v3934_v31 = vld [vmem:[#allocation8 + $0x68] ss:$16 sps:$4 sm:$0xff]   ;;  %v3936_v32 = vld [vmem:[#allocation8 + $0x60] ss:$16 sps:$4 sm:$0xff]   ;;  %v3940_v33 = vld [vmem:[#allocation8 + $0x8c] ss:$16 sps:$4 sm:$0xff]   ;;  %v463_v35 = vpack.c.bf16 %v450_v30, %v449_v29 }
  0xb1   : > { %1118 = vmatpush1.bf16.msra.mxu1 %v3884_v13  ;;  %1075 = vmatpush1.bf16.msra.mxu0 %v3888_v15  ;;  %v3942_v34 = vld [vmem:[#allocation8 + $0x84] ss:$16 sps:$4 sm:$0xff]   ;;  %v3946_v36 = vld [vmem:[#allocation8 + $0x88] ss:$16 sps:$4 sm:$0xff]   ;;  %v3948_v37 = vld [vmem:[#allocation8 + $0x80] ss:$16 sps:$4 sm:$0xff]  }
  0xb2   : > { %584 = vmatprep.mubr.bf16.mxu0 %v4755_v0  ;;  %697 = vmatprep.mubr.bf16.mxu1 %v4755_v0  ;;  %v3950_v38 = vld [vmem:[#allocation8 + $0xac] ss:$16 sps:$4 sm:$0xff]   ;;  %v3954_v39 = vld [vmem:[#allocation8 + $0xa4] ss:$16 sps:$4 sm:$0xff]   ;;  %v3962_v42 = vld [vmem:[#allocation8 + $0xa8] ss:$16 sps:$4 sm:$0xff]  }
  0xb3   : > { %1119 = vmatprep.subr.bf16.mxu1 %v3893_v17  ;;  %1076 = vmatprep.subr.bf16.mxu0 %v3898_v19  ;;  %v452_v41 = vld [vmem:[%s3859_s11 + $0x38] sm:$0xff]  ;;  %v3966_v43 = vld [vmem:[#allocation8 + $0xa0] ss:$16 sps:$4 sm:$0xff]   ;;  %v3972_v45 = vld [vmem:[#allocation8 + $0xc4] ss:$16 sps:$4 sm:$0xff]   ;;  %v854_v30 = vshrl.u32 %v853_v5, 7 }
  0xb4   : > { %v3970_v44 = vld [vmem:[#allocation8 + $0xcc] ss:$16 sps:$4 sm:$0xff]   ;;  %v464_v46 = vpack.c.bf16 %v452_v41, %v451_v40  ;;  %v3976_v47 = vld [vmem:[#allocation8 + $0xc8] ss:$16 sps:$4 sm:$0xff]   ;;  %v3978_v48 = vld [vmem:[#allocation8 + $0xc0] ss:$16 sps:$4 sm:$0xff]  }
  0xb5   : > { %1120 = vmatpush1.bf16.msra.mxu1 %v3902_v20  ;;  %1077 = vmatpush1.bf16.msra.mxu0 %v3904_v21  ;;  %v3982_v49 = vld [vmem:[#allocation8 + $0xec] ss:$16 sps:$4 sm:$0xff]   ;;  %v3984_v50 = vld [vmem:[#allocation8 + $0xe4] ss:$16 sps:$4 sm:$0xff]   ;;  %v3994_v53 = vld [vmem:[#allocation8 + $0xe8] ss:$16 sps:$4 sm:$0xff]  }
  0xb6   : > { %1121 = vmatprep.subr.bf16.mxu1 %v3908_v22  ;;  %1078 = vmatprep.subr.bf16.mxu0 %v3912_v23  ;;  %v453_v51 = vld [vmem:[%s3859_s11 + $0x40] sm:$0xff]  ;;  %v454_v52 = vld [vmem:[%s3859_s11 + $0x48] sm:$0xff]  ;;  %v455_v56 = vld [vmem:[%s3859_s11 + $0x50] sm:$0xff]  ;;  %s3459_s10 = scalar_lea.vmem %s4655_s21, 256  ;;  %p4880_p3 = scmp.ne.s32.totalorder %s4762_s13, 0 }
  0xb7   : > { %v3996_v54 = vld [vmem:[#allocation8 + $0xe0] ss:$16 sps:$4 sm:$0xff]   ;;  %v465_v55 = vpack.c.bf16 %v454_v52, %v453_v51  ;;  %v456_v57 = vld [vmem:[%s3859_s11 + $0x58] sm:$0xff]  ;;  %v458_v60 = vld [vmem:[%s3859_s11 + $0x68] sm:$0xff]  ;;  %v859_v52 = vsub.s32 1, %v854_v30  ;;  %p3460_p1 = scmp.ne.s32.totalorder %s4655_s21, %s3459_s10  ;;  %s3582_s14 = smov [#allocation13]  }
  0xb8   : > { %2736 = vmatmul.mubr.msk.bf16.gmra.mrb[4].mxu0 %vm517_vm0, %v462_v24  ;;  %2744 = vmatmul.mubr.msk.bf16.gmra.mrb[4].mxu1 %vm517_vm0, %v462_v24  ;;  %v466_v58 = vpack.c.bf16 %v456_v57, %v455_v56  ;;  %v457_v59 = vld [vmem:[%s3859_s11 + $0x60] sm:$0xff]  ;;  %v459_v62 = vld [vmem:[%s3859_s11 + $0x70] sm:$0xff]  ;;  %v460_v63 = vld [vmem:[%s3859_s11 + $0x78] sm:$0xff]  ;;  %s3463_s11 = sshll.u32 %s3582_s14, 4  ;;  %s3464_s11 = int_to_ptr.vmem [resolvable:$false] %s3463_s11 }
  0xb9   : > { %594 = vmatprep.mubr.bf16.mxu0 %v4755_v0  ;;  %707 = vmatprep.mubr.bf16.mxu1 %v4755_v0  ;;  %v467_v61 = vpack.c.bf16 %v458_v60, %v457_v59  ;;  %v468_v1 = vpack.c.bf16 %v460_v63, %v459_v62  ;;  %v833_v2 = vld [vmem:[%s384_s0] sm:$0xff]  ;;  %v834_v3 = vld [vmem:[%s384_s0 + $0x8] sm:$0xff]  ;;  %p3461_p5 = pnand %p3460_p1, %p4880_p3  ;;  %s3465_s15 = scalar_lea.vmem %s3464_s11, 512 }
  0xba   : > { %1122 = vmatpush1.bf16.msra.mxu1 %v3916_v25  ;;  %1079 = vmatpush1.bf16.msra.mxu0 %v3920_v26  ;;  %v881_v4 = vpack.c.bf16 %v834_v3, %v833_v2  ;;  %v832_v51 = vld [vmem:[%s4742_s3] sm:$0xf]  ;;  %p3466_p12 = scmp.lt.s32.totalorder %s4655_s21, %s3464_s11  ;;  %p3467_p6 = scmp.lt.s32.totalorder %s3465_s15, %s3459_s10 }
  0xbb   : > { %1123 = vmatprep.subr.bf16.mxu1 %v3922_v27  ;;  %1080 = vmatprep.subr.bf16.mxu0 %v3924_v28  ;;  %v4079_v5 = vrot.slane %v832_v51, %v859_v52  ;;  %p3462_p11 = pneg %p3461_p5 }
  0xbc   : > { %p3468_p13 = por %p3467_p6, %p3466_p12 }
  0xbe   : > { %1124 = vmatpush1.bf16.msra.mxu1 %v3934_v31  ;;  %1081 = vmatpush1.bf16.msra.mxu0 %v3936_v32  ;;  %p3469_p7 = pnand %p3468_p13, %p3462_p11 }
  0xbf   : > { %1125 = vmatprep.subr.bf16.mxu1 %v3940_v33  ;;  %1082 = vmatprep.subr.bf16.mxu0 %v3942_v34 }
  0xc0   : > { %2737 = vmatmul.mubr.msk.bf16.gmra.mrb[8].mxu0 %vm517_vm0, %v463_v35  ;;  %2745 = vmatmul.mubr.msk.bf16.gmra.mrb[8].mxu1 %vm517_vm0, %v463_v35 }
  0xc1   : > { %604 = vmatprep.mubr.bf16.mxu0 %v4755_v0  ;;  %717 = vmatprep.mubr.bf16.mxu1 %v4755_v0 }
  0xc2   : > { %1126 = vmatpush1.bf16.msra.mxu1 %v3946_v36  ;;  %1083 = vmatpush1.bf16.msra.mxu0 %v3948_v37 }
  0xc3   : > { %1127 = vmatprep.subr.bf16.mxu1 %v3950_v38  ;;  %1084 = vmatprep.subr.bf16.mxu0 %v3954_v39 }
  0xc6   : > { %1128 = vmatpush1.bf16.msra.mxu1 %v3962_v42  ;;  %1085 = vmatpush1.bf16.msra.mxu0 %v3966_v43 }
  0xc7   : > { %1129 = vmatprep.subr.bf16.mxu1 %v3970_v44  ;;  %1086 = vmatprep.subr.bf16.mxu0 %v3972_v45 }
  0xc8   : > { %2738 = vmatmul.mubr.msk.bf16.gmra.mrb[12].mxu0 %vm517_vm0, %v464_v46  ;;  %2746 = vmatmul.mubr.msk.bf16.gmra.mrb[12].mxu1 %vm517_vm0, %v464_v46 }
  0xc9   : > { %614 = vmatprep.mubr.bf16.mxu0 %v4755_v0  ;;  %727 = vmatprep.mubr.bf16.mxu1 %v4755_v0 }
  0xca   : > { %1130 = vmatpush1.bf16.msra.mxu1 %v3976_v47  ;;  %1087 = vmatpush1.bf16.msra.mxu0 %v3978_v48 }
  0xcb   : > { %1131 = vmatprep.subr.bf16.mxu1 %v3982_v49  ;;  %1088 = vmatprep.subr.bf16.mxu0 %v3984_v50 }
  0xce   : > { %1132 = vmatpush1.bf16.msra.mxu1 %v3994_v53  ;;  %1089 = vmatpush1.bf16.msra.mxu0 %v3996_v54 }
  0xcf   : > { %1254 = vmatprep.subr.bf16.mxu0 %v3886_v14  ;;  %1297 = vmatprep.subr.bf16.mxu1 %v3882_v11 }
  0xd0   : > { %2739 = vmatmul.mubr.msk.bf16.gmra.mrb[16].mxu0 %vm517_vm0, %v465_v55  ;;  %2747 = vmatmul.mubr.msk.bf16.gmra.mrb[16].mxu1 %vm517_vm0, %v465_v55  ;;  %v867_v55 = vsub.s32 3, %v854_v30 }
  0xd1   : > { %624 = vmatprep.mubr.bf16.mxu0 %v4755_v0  ;;  %737 = vmatprep.mubr.bf16.mxu1 %v4755_v0 }
  0xd8   : > { %2740 = vmatmul.mubr.msk.bf16.gmra.mrb[20].mxu0 %vm517_vm0, %v466_v58  ;;  %2748 = vmatmul.mubr.msk.bf16.gmra.mrb[20].mxu1 %vm517_vm0, %v466_v58 }
  0xd9   : > { %634 = vmatprep.mubr.bf16.mxu0 %v4755_v0  ;;  %747 = vmatprep.mubr.bf16.mxu1 %v4755_v0 }
  0xe0   : > { %2741 = vmatmul.mubr.msk.bf16.gmra.mrb[24].mxu0 %vm517_vm0, %v467_v61  ;;  %2749 = vmatmul.mubr.msk.bf16.gmra.mrb[24].mxu1 %vm517_vm0, %v467_v61 }
  0xe1   : > { %644 = vmatprep.mubr.bf16.mxu0 %v4755_v0  ;;  %757 = vmatprep.mubr.bf16.mxu1 %v4755_v0 }
  0xe8   : > { %2742 = vmatmul.mubr.msk.bf16.gmra.mrb[28].mxu0 %vm517_vm0, %v468_v1  ;;  %2750 = vmatmul.mubr.msk.bf16.gmra.mrb[28].mxu1 %vm517_vm0, %v468_v1 }
  0xe9   : > { %1106 = vmatprep.mubr.bf16.mxu0 %v4755_v0  ;;  %1149 = vmatprep.mubr.bf16.mxu1 %v4755_v0 }
  0xf0   : > { %1107 = vmatmul.mubr.bf16.vlgmr.msra.gmra.mrb[32].mxu0 %v881_v4  ;;  %1150 = vmatmul.mubr.bf16.vlgmr.msra.gmra.mrb[32].mxu1 %v881_v4 }
  0xf1   : > { %1255 = vmatpush1.bf16.msra.mxu0 %v3888_v15  ;;  %1298 = vmatpush1.bf16.msra.mxu1 %v3884_v13 }
  0xf2   : > { %1256 = vmatprep.subr.bf16.mxu0 %v3898_v19  ;;  %1299 = vmatprep.subr.bf16.mxu1 %v3893_v17 }
  0xf3   : > { %1286 = vmatprep.mubr.bf16.mxu0 %v4755_v0  ;;  %1329 = vmatprep.mubr.bf16.mxu1 %v4755_v0 }
  0xf5   : > { %1257 = vmatpush1.bf16.msra.mxu0 %v3904_v21  ;;  %1300 = vmatpush1.bf16.msra.mxu1 %v3902_v20 }
  0xf6   : > { %1258 = vmatprep.subr.bf16.mxu0 %v3912_v23  ;;  %1301 = vmatprep.subr.bf16.mxu1 %v3908_v22 }
  0xf9   : > { %1259 = vmatpush1.bf16.msra.mxu0 %v3920_v26  ;;  %1302 = vmatpush1.bf16.msra.mxu1 %v3916_v25 }
  0xfa   : > { %1260 = vmatprep.subr.bf16.mxu0 %v3924_v28  ;;  %1303 = vmatprep.subr.bf16.mxu1 %v3922_v27 }
  0xfd   : > { %1261 = vmatpush1.bf16.msra.mxu0 %v3936_v32  ;;  %1304 = vmatpush1.bf16.msra.mxu1 %v3934_v31 }
  0xfe   : > { %1262 = vmatprep.subr.bf16.mxu0 %v3942_v34  ;;  %1305 = vmatprep.subr.bf16.mxu1 %v3940_v33 }
 0x101   : > { %1263 = vmatpush1.bf16.msra.mxu0 %v3948_v37  ;;  %1306 = vmatpush1.bf16.msra.mxu1 %v3946_v36 }
 0x102   : > { %1264 = vmatprep.subr.bf16.mxu0 %v3954_v39  ;;  %1307 = vmatprep.subr.bf16.mxu1 %v3950_v38 }
 0x105   : > { %1265 = vmatpush1.bf16.msra.mxu0 %v3966_v43  ;;  %1308 = vmatpush1.bf16.msra.mxu1 %v3962_v42 }
 0x106   : > { %1266 = vmatprep.subr.bf16.mxu0 %v3972_v45  ;;  %1309 = vmatprep.subr.bf16.mxu1 %v3970_v44 }
 0x109   : > { %1267 = vmatpush1.bf16.msra.mxu0 %v3978_v48  ;;  %1310 = vmatpush1.bf16.msra.mxu1 %v3976_v47 }
 0x10a   : > { %1268 = vmatprep.subr.bf16.mxu0 %v3984_v50  ;;  %1311 = vmatprep.subr.bf16.mxu1 %v3982_v49 }
 0x10d   : > { %1269 = vmatpush1.bf16.msra.mxu0 %v3996_v54  ;;  %1312 = vmatpush1.bf16.msra.mxu1 %v3994_v53 }
 0x10e   : > { %1434 = vmatprep.subr.bf16.mxu0 %v3886_v14  ;;  %1477 = vmatprep.subr.bf16.mxu1 %v3882_v11  ;;  %v855_v14 = vsub.s32 0, %v854_v30  ;;  %v863_v11 = vsub.s32 2, %v854_v30 }
 0x110   : > { %v4075_v1 = vrot.slane %v832_v51, %v855_v14  ;;  %v4077_v2 = vrot.slane %v832_v51, %v863_v11 }
 0x183   : > { %v689_v6 = vpop.f32.mrb[0].mxu1  ;;  %v576_v7 = vpop.f32.mrb[0].mxu0 }
 0x184   : > { %v691_v8 = vpop.f32.mrb[1].mxu1  ;;  %v578_v9 = vpop.f32.mrb[1].mxu0 }
 0x185   : > { %v693_v10 = vpop.f32.mrb[2].mxu1  ;;  %v580_v12 = vpop.f32.mrb[2].mxu0 }
 0x186   : > { %v4064_v16 = vpack.c.bf16 %v693_v10, %v689_v6  ;;  %v4066_v18 = vpack.c.bf16 %v580_v12, %v576_v7  ;;  %v695_v24 = vpop.f32.mrb[3].mxu1  ;;  %v582_v29 = vpop.f32.mrb[3].mxu0  ;;  %v4081_v6 = vrot.slane %v832_v51, %v867_v55 }
 0x187   : > { %v4068_v35 = vpack.c.bf16 %v695_v24, %v691_v8  ;;  %v4070_v40 = vpack.c.bf16 %v582_v29, %v578_v9 }
 0x18b   : > { %v699_v41 = vpop.f32.mrb[4].mxu1  ;;  %v586_v46 = vpop.f32.mrb[4].mxu0 }
 0x18c   : > { %v701_v56 = vpop.f32.mrb[5].mxu1  ;;  %v588_v57 = vpop.f32.mrb[5].mxu0 }
 0x18d   : > { %v703_v58 = vpop.f32.mrb[6].mxu1  ;;  %v590_v59 = vpop.f32.mrb[6].mxu0 }
 0x18e   : > { %v774_v60 = vpack.c.bf16 %v703_v58, %v699_v41  ;;  %v772_v61 = vpack.c.bf16 %v590_v59, %v586_v46  ;;  %v705_v62 = vpop.f32.mrb[7].mxu1  ;;  %v592_v63 = vpop.f32.mrb[7].mxu0 }
 0x18f   : > { %v775_v3 = vpack.c.bf16 %v705_v62, %v701_v56  ;;  %v773_v4 = vpack.c.bf16 %v592_v63, %v588_v57 }
 0x190   : > { %v1239_v7 = vunpack.c.l.bf16 %v774_v60  ;;  %v1243_v8 = vunpack.c.h.bf16 %v774_v60  ;;  %v1237_v9 = vunpack.c.l.bf16 %v772_v61  ;;  %v1241_v10 = vunpack.c.h.bf16 %v772_v61 }
 0x191   : > { %v1240_v12 = vunpack.c.l.bf16 %v775_v3  ;;  %v1244_v24 = vunpack.c.h.bf16 %v775_v3  ;;  %v1238_v29 = vunpack.c.l.bf16 %v773_v4  ;;  %v1242_v30 = vunpack.c.h.bf16 %v773_v4 }
 0x192   : > { %v4084_v41 = vadd.f32 %v1237_v9, %v4075_v1  ;;  %v4087_v14 = vadd.f32 %v1239_v7, %v4077_v2  ;;  %v4090_v11 = vadd.f32 %v1241_v10, %v4075_v1  ;;  %v4093_v46 = vadd.f32 %v1243_v8, %v4077_v2 }
 0x193   : > { %v709_v51 = vpop.f32.mrb[8].mxu1  ;;  %v596_v52 = vpop.f32.mrb[8].mxu0  ;;  %v4096_v55 = vadd.f32 %v1238_v29, %v4079_v5  ;;  %v4099_v56 = vadd.f32 %v1240_v12, %v4081_v6  ;;  %v4102_v57 = vadd.f32 %v1242_v30, %v4079_v5  ;;  %v4105_v58 = vadd.f32 %v1244_v24, %v4081_v6 }
 0x194   : > { %4773 = vst [vmem:[#allocation26_spill] sm:$0xff] %v4084_v41  ;;  %4774 = vst [vmem:[#allocation27_spill] sm:$0xff] %v4087_v14  ;;  %v711_v59 = vpop.f32.mrb[9].mxu1  ;;  %v598_v60 = vpop.f32.mrb[9].mxu0 }
 0x195   : > { %4775 = vst [vmem:[#allocation28_spill] sm:$0xff] %v4090_v11  ;;  %4776 = vst [vmem:[#allocation29_spill] sm:$0xff] %v4093_v46  ;;  %v713_v61 = vpop.f32.mrb[10].mxu1  ;;  %v600_v62 = vpop.f32.mrb[10].mxu0 }
 0x196   : > { %4777 = vst [vmem:[#allocation30_spill] sm:$0xff] %v4096_v55  ;;  %4778 = vst [vmem:[#allocation31_spill] sm:$0xff] %v4099_v56  ;;  %v778_v63 = vpack.c.bf16 %v713_v61, %v709_v51  ;;  %v776_v3 = vpack.c.bf16 %v600_v62, %v596_v52  ;;  %v715_v4 = vpop.f32.mrb[11].mxu1  ;;  %v602_v7 = vpop.f32.mrb[11].mxu0 }
 0x197   : > { %4779 = vst [vmem:[#allocation32_spill] sm:$0xff] %v4102_v57  ;;  %4780 = vst [vmem:[#allocation33_spill] sm:$0xff] %v4105_v58  ;;  %v779_v8 = vpack.c.bf16 %v715_v4, %v711_v59  ;;  %v777_v9 = vpack.c.bf16 %v602_v7, %v598_v60 }
 0x198   : > { %v1419_v10 = vunpack.c.l.bf16 %v778_v63  ;;  %v1423_v29 = vunpack.c.h.bf16 %v778_v63  ;;  %v1417_v12 = vunpack.c.l.bf16 %v776_v3  ;;  %v1421_v0 = vunpack.c.h.bf16 %v776_v3 }
 0x199   : > { %v1420_v46 = vunpack.c.l.bf16 %v779_v8  ;;  %v1424_v30 = vunpack.c.h.bf16 %v779_v8  ;;  %v1418_v57 = vunpack.c.l.bf16 %v777_v9  ;;  %v1422_v11 = vunpack.c.h.bf16 %v777_v9 }
 0x19a   : > { %v4108_v24 = vadd.f32 %v1417_v12, %v4075_v1  ;;  %v4111_v58 = vadd.f32 %v1419_v10, %v4077_v2  ;;  %v4114_v51 = vadd.f32 %v1421_v0, %v4075_v1  ;;  %v4117_v52 = vadd.f32 %v1423_v29, %v4077_v2 }
 0x19b   : > { %v719_v59 = vpop.f32.mrb[12].mxu1  ;;  %v606_v60 = vpop.f32.mrb[12].mxu0  ;;  %v4120_v61 = vadd.f32 %v1418_v57, %v4079_v5  ;;  %v4123_v62 = vadd.f32 %v1420_v46, %v4081_v6  ;;  %v4126_v63 = vadd.f32 %v1422_v11, %v4079_v5  ;;  %v4129_v3 = vadd.f32 %v1424_v30, %v4081_v6 }
 0x19c   : > { %4781 = vst [vmem:[#allocation34_spill] sm:$0xff] %v4108_v24  ;;  %4782 = vst [vmem:[#allocation35_spill] sm:$0xff] %v4111_v58  ;;  %v721_v4 = vpop.f32.mrb[13].mxu1  ;;  %v608_v0 = vpop.f32.mrb[13].mxu0 }
 0x19d   : > { %4783 = vst [vmem:[#allocation36_spill] sm:$0xff] %v4114_v51  ;;  %4784 = vst [vmem:[#allocation37_spill] sm:$0xff] %v4117_v52  ;;  %v723_v7 = vpop.f32.mrb[14].mxu1  ;;  %v610_v8 = vpop.f32.mrb[14].mxu0 }
 0x19e   : > { %4785 = vst [vmem:[#allocation38_spill] sm:$0xff] %v4120_v61  ;;  %4786 = vst [vmem:[#allocation39_spill] sm:$0xff] %v4123_v62  ;;  %v782_v9 = vpack.c.bf16 %v723_v7, %v719_v59  ;;  %v780_v10 = vpack.c.bf16 %v610_v8, %v606_v60  ;;  %v725_v29 = vpop.f32.mrb[15].mxu1  ;;  %v612_v12 = vpop.f32.mrb[15].mxu0 }
 0x19f   : > { %4787 = vst [vmem:[#allocation40_spill] sm:$0xff] %v4126_v63  ;;  %4788 = vst [vmem:[#allocation41_spill] sm:$0xff] %v4129_v3  ;;  %v783_v52 = vpack.c.bf16 %v725_v29, %v721_v4  ;;  %v781_v57 = vpack.c.bf16 %v612_v12, %v608_v0 }
 0x1a0   : > { %v1599_v51 = vunpack.c.l.bf16 %v782_v9  ;;  %v1603_v61 = vunpack.c.h.bf16 %v782_v9  ;;  %v1597_v46 = vunpack.c.l.bf16 %v780_v10  ;;  %v1601_v62 = vunpack.c.h.bf16 %v780_v10 }
 0x1a1   : > { %v1600_v58 = vunpack.c.l.bf16 %v783_v52  ;;  %v1604_v11 = vunpack.c.h.bf16 %v783_v52  ;;  %v1598_v63 = vunpack.c.l.bf16 %v781_v57  ;;  %v1602_v24 = vunpack.c.h.bf16 %v781_v57 }
 0x1a2   : > { %v4132_v30 = vadd.f32 %v1597_v46, %v4075_v1  ;;  %v4135_v3 = vadd.f32 %v1599_v51, %v4077_v2  ;;  %v4138_v59 = vadd.f32 %v1601_v62, %v4075_v1  ;;  %v4141_v60 = vadd.f32 %v1603_v61, %v4077_v2 }
 0x1a3   : > { %v729_v4 = vpop.f32.mrb[16].mxu1  ;;  %v616_v0 = vpop.f32.mrb[16].mxu0  ;;  %v4144_v7 = vadd.f32 %v1598_v63, %v4079_v5  ;;  %v4147_v52 = vadd.f32 %v1600_v58, %v4081_v6  ;;  %v4150_v8 = vadd.f32 %v1602_v24, %v4079_v5  ;;  %v4153_v51 = vadd.f32 %v1604_v11, %v4081_v6 }
 0x1a4   : > { %4789 = vst [vmem:[#allocation42_spill] sm:$0xff] %v4132_v30  ;;  %4790 = vst [vmem:[#allocation43_spill] sm:$0xff] %v4135_v3  ;;  %v731_v9 = vpop.f32.mrb[17].mxu1  ;;  %v618_v62 = vpop.f32.mrb[17].mxu0 }
 0x1a5   : > { %4791 = vst [vmem:[#allocation44_spill] sm:$0xff] %v4138_v59  ;;  %4792 = vst [vmem:[#allocation45_spill] sm:$0xff] %v4141_v60  ;;  %v733_v10 = vpop.f32.mrb[18].mxu1  ;;  %v620_v29 = vpop.f32.mrb[18].mxu0 }
 0x1a6   : > { %4793 = vst [vmem:[#allocation46_spill] sm:$0xff] %v4144_v7  ;;  %4794 = vst [vmem:[#allocation47_spill] sm:$0xff] %v4147_v52  ;;  %v786_v61 = vpack.c.bf16 %v733_v10, %v729_v4  ;;  %v784_v12 = vpack.c.bf16 %v620_v29, %v616_v0  ;;  %v735_v57 = vpop.f32.mrb[19].mxu1  ;;  %v622_v46 = vpop.f32.mrb[19].mxu0 }
 0x1a7   : > { %4795 = vst [vmem:[#allocation48_spill] sm:$0xff] %v4150_v8  ;;  %4796 = vst [vmem:[#allocation49_spill] sm:$0xff] %v4153_v51  ;;  %v787_v60 = vpack.c.bf16 %v735_v57, %v731_v9  ;;  %v785_v63 = vpack.c.bf16 %v622_v46, %v618_v62 }
 0x1a8   : > { %v1779_v59 = vunpack.c.l.bf16 %v786_v61  ;;  %v1783_v7 = vunpack.c.h.bf16 %v786_v61  ;;  %v1777_v58 = vunpack.c.l.bf16 %v784_v12  ;;  %v1781_v52 = vunpack.c.h.bf16 %v784_v12 }
 0x1a9   : > { %v1780_v3 = vunpack.c.l.bf16 %v787_v60  ;;  %v1784_v24 = vunpack.c.h.bf16 %v787_v60  ;;  %v1778_v8 = vunpack.c.l.bf16 %v785_v63  ;;  %v1782_v30 = vunpack.c.h.bf16 %v785_v63 }
 0x1aa   : > { %v4156_v11 = vadd.f32 %v1777_v58, %v4075_v1  ;;  %v4159_v51 = vadd.f32 %v1779_v59, %v4077_v2  ;;  %v4162_v4 = vadd.f32 %v1781_v52, %v4075_v1  ;;  %v4165_v0 = vadd.f32 %v1783_v7, %v4077_v2 }
 0x1ab   : > { %v739_v9 = vpop.f32.mrb[20].mxu1  ;;  %v626_v62 = vpop.f32.mrb[20].mxu0  ;;  %v4168_v10 = vadd.f32 %v1778_v8, %v4079_v5  ;;  %v4171_v60 = vadd.f32 %v1780_v3, %v4081_v6  ;;  %v4174_v29 = vadd.f32 %v1782_v30, %v4079_v5  ;;  %v4177_v59 = vadd.f32 %v1784_v24, %v4081_v6 }
 0x1ac   : > { %4797 = vst [vmem:[#allocation50_spill] sm:$0xff] %v4156_v11  ;;  %4798 = vst [vmem:[#allocation51_spill] sm:$0xff] %v4159_v51  ;;  %v741_v61 = vpop.f32.mrb[21].mxu1  ;;  %v628_v52 = vpop.f32.mrb[21].mxu0 }
 0x1ad   : > { %4799 = vst [vmem:[#allocation52_spill] sm:$0xff] %v4162_v4  ;;  %4800 = vst [vmem:[#allocation53_spill] sm:$0xff] %v4165_v0  ;;  %v743_v12 = vpop.f32.mrb[22].mxu1  ;;  %v630_v57 = vpop.f32.mrb[22].mxu0 }
 0x1ae   : > { %4801 = vst [vmem:[#allocation54_spill] sm:$0xff] %v4168_v10  ;;  %4802 = vst [vmem:[#allocation55_spill] sm:$0xff] %v4171_v60  ;;  %v790_v7 = vpack.c.bf16 %v743_v12, %v739_v9  ;;  %v788_v46 = vpack.c.bf16 %v630_v57, %v626_v62  ;;  %v745_v63 = vpop.f32.mrb[23].mxu1  ;;  %v632_v58 = vpop.f32.mrb[23].mxu0 }
 0x1af   : > { %4803 = vst [vmem:[#allocation56_spill] sm:$0xff] %v4174_v29  ;;  %4804 = vst [vmem:[#allocation57_spill] sm:$0xff] %v4177_v59  ;;  %v791_v0 = vpack.c.bf16 %v745_v63, %v741_v61  ;;  %v789_v8 = vpack.c.bf16 %v632_v58, %v628_v52  ;;  %v844_v58 = vunpack.c.l.bf16 %v4066_v18 }
 0x1b0   : > { %v1959_v4 = vunpack.c.l.bf16 %v790_v7  ;;  %v1963_v10 = vunpack.c.h.bf16 %v790_v7  ;;  %v1957_v3 = vunpack.c.l.bf16 %v788_v46  ;;  %v1961_v60 = vunpack.c.h.bf16 %v788_v46 }
 0x1b1   : > { %v1960_v51 = vunpack.c.l.bf16 %v791_v0  ;;  %v1964_v30 = vunpack.c.h.bf16 %v791_v0  ;;  %v1958_v29 = vunpack.c.l.bf16 %v789_v8  ;;  %v1962_v11 = vunpack.c.h.bf16 %v789_v8 }
 0x1b2   : > { %v4180_v24 = vadd.f32 %v1957_v3, %v4075_v1  ;;  %v4183_v59 = vadd.f32 %v1959_v4, %v4077_v2  ;;  %v4186_v9 = vadd.f32 %v1961_v60, %v4075_v1  ;;  %v4189_v62 = vadd.f32 %v1963_v10, %v4077_v2 }
 0x1b3   : > { %v749_v61 = vpop.f32.mrb[24].mxu1  ;;  %v636_v52 = vpop.f32.mrb[24].mxu0  ;;  %v4192_v12 = vadd.f32 %v1958_v29, %v4079_v5  ;;  %v4195_v0 = vadd.f32 %v1960_v51, %v4081_v6  ;;  %v4198_v57 = vadd.f32 %v1962_v11, %v4079_v5  ;;  %v4201_v4 = vadd.f32 %v1964_v30, %v4081_v6 }
 0x1b4   : > { %4805 = vst [vmem:[#allocation58_spill] sm:$0xff] %v4180_v24  ;;  %4806 = vst [vmem:[#allocation59_spill] sm:$0xff] %v4183_v59  ;;  %v751_v7 = vpop.f32.mrb[25].mxu1  ;;  %v638_v60 = vpop.f32.mrb[25].mxu0  ;;  %v846_v10 = vunpack.c.l.bf16 %v4064_v16  ;;  %v847_v51 = vunpack.c.l.bf16 %v4068_v35  ;;  %v845_v11 = vunpack.c.l.bf16 %v4070_v40 }
 0x1b5   : > { %4807 = vst [vmem:[#allocation60_spill] sm:$0xff] %v4186_v9  ;;  %4808 = vst [vmem:[#allocation61_spill] sm:$0xff] %v4189_v62  ;;  %v753_v46 = vpop.f32.mrb[26].mxu1  ;;  %v640_v63 = vpop.f32.mrb[26].mxu0 }
 0x1b6   : > { %4809 = vst [vmem:[#allocation62_spill] sm:$0xff] %v4192_v12  ;;  %4810 = vst [vmem:[#allocation63_spill] sm:$0xff] %v4195_v0  ;;  %v794_v8 = vpack.c.bf16 %v753_v46, %v749_v61  ;;  %v792_v29 = vpack.c.bf16 %v640_v63, %v636_v52  ;;  %v755_v3 = vpop.f32.mrb[27].mxu1  ;;  %v642_v62 = vpop.f32.mrb[27].mxu0 }
 0x1b7   : > { %4811 = vst [vmem:[#allocation64_spill] sm:$0xff] %v4198_v57  ;;  %4812 = vst [vmem:[#allocation65_spill] sm:$0xff] %v4201_v4  ;;  %v795_v57 = vpack.c.bf16 %v755_v3, %v751_v7  ;;  %v793_v9 = vpack.c.bf16 %v642_v62, %v638_v60 }
 0x1b8   : > { %v2139_v30 = vunpack.c.l.bf16 %v794_v8  ;;  %v2143_v4 = vunpack.c.h.bf16 %v794_v8  ;;  %v2137_v0 = vunpack.c.l.bf16 %v792_v29  ;;  %v2141_v12 = vunpack.c.h.bf16 %v792_v29 }
 0x1b9   : > { %v2140_v59 = vunpack.c.l.bf16 %v795_v57  ;;  %v2144_v24 = vunpack.c.h.bf16 %v795_v57  ;;  %v2138_v56 = vunpack.c.l.bf16 %v793_v9  ;;  %v2142_v55 = vunpack.c.h.bf16 %v793_v9 }
 0x1ba   : > { %v4208_v14 = vadd.f32 %v2137_v0, %v4075_v1  ;;  %v4211_v61 = vadd.f32 %v2139_v30, %v4077_v2  ;;  %v4214_v52 = vadd.f32 %v2141_v12, %v4075_v1  ;;  %v4217_v7 = vadd.f32 %v2143_v4, %v4077_v2 }
 0x1bb   : > { %v759_v62 = vpop.f32.mrb[28].mxu1  ;;  %v646_v60 = vpop.f32.mrb[28].mxu0  ;;  %v4220_v46 = vadd.f32 %v2138_v56, %v4079_v5  ;;  %v4223_v57 = vadd.f32 %v2140_v59, %v4081_v6  ;;  %v4226_v9 = vadd.f32 %v2142_v55, %v4079_v5  ;;  %v4229_v0 = vadd.f32 %v2144_v24, %v4081_v6 }
 0x1bc   : > { %4813 = vst [vmem:[#allocation66_spill] sm:$0xff] %v4208_v14  ;;  %4814 = vst [vmem:[#allocation67_spill] sm:$0xff] %v4211_v61  ;;  %v761_v63 = vpop.f32.mrb[29].mxu1  ;;  %v648_v12 = vpop.f32.mrb[29].mxu0  ;;  %v850_v8 = vunpack.c.h.bf16 %v4064_v16  ;;  %v848_v4 = vunpack.c.h.bf16 %v4066_v18  ;;  %v851_v29 = vunpack.c.h.bf16 %v4068_v35  ;;  %v849_v56 = vunpack.c.h.bf16 %v4070_v40 }
 0x1bd   : > { %4815 = vst [vmem:[#allocation68_spill] sm:$0xff] %v4214_v52  ;;  %4816 = vst [vmem:[#allocation69_spill] sm:$0xff] %v4217_v7  ;;  %v763_v3 = vpop.f32.mrb[30].mxu1  ;;  %v650_v30 = vpop.f32.mrb[30].mxu0  ;;  %v875_v24 = vadd.f32 %v4077_v2, %v846_v10  ;;  %v874_v16 = vadd.f32 %v4079_v5, %v845_v11  ;;  %v876_v18 = vadd.f32 %v4081_v6, %v847_v51 }
 0x1be   : > { %4817 = vst [vmem:[#allocation70_spill] sm:$0xff] %v4220_v46  ;;  %4818 = vst [vmem:[#allocation71_spill] sm:$0xff] %v4223_v57  ;;  %v798_v59 = vpack.c.bf16 %v763_v3, %v759_v62  ;;  %v796_v7 = vpack.c.bf16 %v650_v30, %v646_v60  ;;  %v765_v52 = vpop.f32.mrb[31].mxu1  ;;  %v652_v55 = vpop.f32.mrb[31].mxu0 }
 0x1bf   : > { %4819 = vst [vmem:[#allocation72_spill] sm:$0xff] %v4226_v9  ;;  %4820 = vst [vmem:[#allocation73_spill] sm:$0xff] %v4229_v0  ;;  %v873_v9 = vadd.f32 %v4075_v1, %v844_v58  ;;  %v799_v0 = vpack.c.bf16 %v765_v52, %v761_v63  ;;  %v797_v57 = vpack.c.bf16 %v652_v55, %v648_v12 }
 0x1c0   : > { %v2319_v46 = vunpack.c.l.bf16 %v798_v59  ;;  %v2323_v35 = vunpack.c.h.bf16 %v798_v59  ;;  %v2317_v61 = vunpack.c.l.bf16 %v796_v7  ;;  %v2321_v40 = vunpack.c.h.bf16 %v796_v7 }
 0x1c1   : > { %v2320_v14 = vunpack.c.l.bf16 %v799_v0  ;;  %v2324_v41 = vunpack.c.h.bf16 %v799_v0  ;;  %v2318_v62 = vunpack.c.l.bf16 %v797_v57  ;;  %v2322_v60 = vunpack.c.h.bf16 %v797_v57 }
 0x1c2   : > { %v4240_v3 = vadd.f32 %v2317_v61, %v4075_v1  ;;  %v4243_v58 = vadd.f32 %v2319_v46, %v4077_v2  ;;  %v4246_v10 = vadd.f32 %v2321_v40, %v4075_v1  ;;  %v4249_v11 = vadd.f32 %v2323_v35, %v4077_v2 }
 0x1c3   : > { %v1108_v51 = vpop.f32.mrb[32].mxu0  ;;  %v1151_v52 = vpop.f32.mrb[32].mxu1  ;;  %v4252_v7 = vadd.f32 %v2318_v62, %v4079_v5  ;;  %v4255_v0 = vadd.f32 %v2320_v14, %v4081_v6  ;;  %v4258_v61 = vadd.f32 %v2322_v60, %v4079_v5  ;;  %v4261_v46 = vadd.f32 %v2324_v41, %v4081_v6 }
 0x1c4   : > { %4821 = vst [vmem:[#allocation74_spill] sm:$0xff] %v4246_v10  ;;  %4822 = vst [vmem:[#allocation75_spill] sm:$0xff] %v4249_v11  ;;  %v1160_v57 = vadd.f32 %v1108_v51, %v873_v9  ;;  %v1162_v63 = vadd.f32 %v1151_v52, %v875_v24  ;;  %v1110_v12 = vpop.f32.mrb[33].mxu0  ;;  %v1153_v30 = vpop.f32.mrb[33].mxu1  ;;  %v877_v59 = vadd.f32 %v4075_v1, %v848_v4 }
 0x1c5   : > { %4823 = vst [vmem:[#allocation76_spill] sm:$0xff] %v4255_v0  ;;  %4824 = vst [vmem:[#allocation77_spill] sm:$0xff] %v4258_v61  ;;  %v879_v55 = vadd.f32 %v4077_v2, %v850_v8  ;;  %v1161_v35 = vadd.f32 %v1110_v12, %v874_v16  ;;  %v1163_v40 = vadd.f32 %v1153_v30, %v876_v18  ;;  %v1112_v62 = vpop.f32.mrb[34].mxu0  ;;  %v1155_v11 = vpop.f32.mrb[34].mxu1 }
 0x1c6   : > { %4825 = vst [vmem:[#allocation78_spill] sm:$0xff] %v4261_v46  ;;  %v878_v14 = vadd.f32 %v4079_v5, %v849_v56  ;;  %v880_v60 = vadd.f32 %v4081_v6, %v851_v29  ;;  %v2783_v61 = vmul.f32 -1.442695, %v1160_v57  ;;  %v2785_v10 = vmul.f32 -1.442695, %v1162_v63  ;;  %v1114_v9 = vpop.f32.mrb[35].mxu0 }
 0x1c7   : > { %v1164_v41 = vadd.f32 %v1112_v62, %v877_v59  ;;  %v1166_v46 = vadd.f32 %v1155_v11, %v879_v55  ;;  %v1157_v24 = vpop.f32.mrb[35].mxu1  ;;  %v2784_v51 = vmul.f32 -1.442695, %v1161_v35  ;;  %v2786_v4 = vmul.f32 -1.442695, %v1163_v40  ;;  %v835_v40 = vld [vmem:[%s393_s30] sm:$0xff] }
 0x1c8   : > { %v1165_v52 = vadd.f32 %v1114_v9, %v878_v14  ;;  %v1167_v0 = vadd.f32 %v1157_v24, %v880_v60  ;;  %3027 = vpow2.f32 %v2783_v61 }
 0x1c9   : > { %v2787_v1 = vmul.f32 -1.442695, %v1164_v41  ;;  %3029 = vpow2.f32 %v2785_v10  ;;  %v2789_v2 = vmul.f32 -1.442695, %v1166_v46 }
 0x1ca   : > { %3031 = vpow2.f32 %v2784_v51  ;;  %v2788_v8 = vmul.f32 -1.442695, %v1165_v52  ;;  %v2790_v61 = vmul.f32 -1.442695, %v1167_v0 }
 0x1cb   : > { %3033 = vpow2.f32 %v2787_v1  ;;  %v836_v1 = vld [vmem:[%s393_s30 + $0x8] sm:$0xff] }
 0x1cc   : > { %3035 = vpow2.f32 %v2789_v2 }
 0x1cd   : > { %3037 = vpow2.f32 %v2788_v8 }
 0x1d2   : > { %v3028_v5 = vpop.eup %3027 }
 0x1d3   : > { %v3030_v6 = vpop.eup %3029  ;;  %v1192_v16 = vadd.f32 1.0, %v3028_v5 }
 0x1d4   : > { %v3032_v29 = vpop.eup %3031  ;;  %v1194_v56 = vadd.f32 1.0, %v3030_v6 }
 0x1d5   : > { %v1193_v18 = vadd.f32 1.0, %v3032_v29  ;;  %v3034_v11 = vpop.eup %3033 }
 0x1d6   : > { %3039 = vrcp.f32 %v1194_v56  ;;  %v3036_v57 = vpop.eup %3035  ;;  %v1196_v12 = vadd.f32 1.0, %v3034_v11 }
 0x1d7   : > { %3041 = vpow2.f32 %v2786_v4  ;;  %v3038_v10 = vpop.eup %3037  ;;  %v1198_v46 = vadd.f32 1.0, %v3036_v57 }
 0x1d8   : > { %3043 = vrcp.f32 %v1193_v18  ;;  %v1197_v63 = vadd.f32 1.0, %v3038_v10 }
 0x1d9   : > { %3045 = vrcp.f32 %v1192_v16 }
 0x1da   : > { %3047 = vrcp.f32 %v1198_v46 }
 0x1db   : > { %3049 = vpow2.f32 %v2790_v61 }
 0x1dc   : > { %3051 = vrcp.f32 %v1197_v63  ;;  %v4826_v63 = vmov 0  }
 0x1dd   : > { %3053 = vrcp.f32 %v1196_v12 }
 0x1e0   : > { %v3040_v30 = vpop.eup %3039 }
 0x1e1   : > { %v3042_v59 = vpop.eup %3041  ;;  %v1216_v55 = vmul.f32 2.0, %v3040_v30 }
 0x1e2   : > { %v3044_v35 = vpop.eup %3043  ;;  %v1195_v52 = vadd.f32 1.0, %v3042_v59 }
 0x1e3   : > { %v3046_v62 = vpop.eup %3045  ;;  %v2791_v14 = vadd.f32 -1.0, %v1216_v55  ;;  %v1220_v9 = vmul.f32 %v3044_v35, %v835_v40 }
 0x1e4   : > { %v3048_v60 = vpop.eup %3047  ;;  %3055 = vrcp.f32 %v1195_v52 }
 0x1e5   : > { %v3050_v0 = vpop.eup %3049  ;;  %v1222_v41 = vmul.f32 %v3046_v62, %v2791_v14  ;;  %v1217_v24 = vmul.f32 2.0, %v3048_v60 }
 0x1e6   : > { %v3052_v51 = vpop.eup %3051  ;;  %v1199_v6 = vadd.f32 1.0, %v3050_v0 }
 0x1e7   : > { %v4268_v2 = vadd.f32 %v1222_v41, %v1220_v9  ;;  %v2792_v8 = vadd.f32 -1.0, %v1217_v24  ;;  %v3054_v5 = vpop.eup %3053  ;;  %v1221_v29 = vmul.f32 %v3052_v51, %v836_v1 }
 0x1e9   : > { %v1223_v4 = vmul.f32 %v3054_v5, %v2792_v8  ;;  %3057 = vtanh.f32 %v4268_v2 }
 0x1ea   : > { %3059 = vrcp.f32 %v1199_v6 }
 0x1eb   : > { %v4271_v56 = vadd.f32 %v1223_v4, %v1221_v29 }
 0x1ed   : > { %3061 = vtanh.f32 %v4271_v56 }
 0x1ee   : > { %v3056_v16 = vpop.eup %3055 }
 0x1f3   : > { %v3058_v18 = vpop.eup %3057 }
 0x1f4   : > { %v3060_v11 = vpop.eup %3059  ;;  %v1228_v61 = vmul.f32 %v3058_v18, %v3056_v16 }
 0x1f7   : > { %v3062_v57 = vpop.eup %3061 }
 0x1f8   : > { %v1229_v10 = vmul.f32 %v3062_v57, %v3060_v11 }
 0x1fa   : > { %v1253_v46 = vpack.c.bf16 %v1229_v10, %v1228_v61 }
 0x1fc   : > { %1287 = vmatmul.mubr.bf16.vlgmr.msra.gmra.mrb[36].mxu0 %v1253_v46  ;;  %1330 = vmatmul.mubr.bf16.vlgmr.msra.gmra.mrb[36].mxu1 %v1253_v46 }
 0x1fd   : > { %1435 = vmatpush1.bf16.msra.mxu0 %v3888_v15  ;;  %1478 = vmatpush1.bf16.msra.mxu1 %v3884_v13  ;;  %v4306_v13 = vld [vmem:[#allocation8 + $0x4] ss:$16 sps:$4 sm:$0xff]   ;;  %v4309_v15 = vld [vmem:[#allocation8 + $0xc] ss:$16 sps:$4 sm:$0xff]  }
 0x1fe   : > { %1436 = vmatprep.subr.bf16.mxu0 %v3898_v19  ;;  %1479 = vmatprep.subr.bf16.mxu1 %v3893_v17 }
 0x1ff   : > { %1466 = vmatprep.mubr.bf16.mxu0 %v4826_v63  ;;  %1509 = vmatprep.mubr.bf16.mxu1 %v4826_v63 }
 0x201   : > { %1437 = vmatpush1.bf16.msra.mxu0 %v3904_v21  ;;  %1480 = vmatpush1.bf16.msra.mxu1 %v3902_v20  ;;  %v4827_v20 = vld [vmem:[#allocation26_spill] sm:$0xff] }
 0x202   : > { %1438 = vmatprep.subr.bf16.mxu0 %v3912_v23  ;;  %1481 = vmatprep.subr.bf16.mxu1 %v3908_v22  ;;  %v4828_v22 = vld [vmem:[#allocation27_spill] sm:$0xff] }
 0x205   : > { %1439 = vmatpush1.bf16.msra.mxu0 %v3920_v26  ;;  %1482 = vmatpush1.bf16.msra.mxu1 %v3916_v25 }
 0x206   : > { %1440 = vmatprep.subr.bf16.mxu0 %v3924_v28  ;;  %1483 = vmatprep.subr.bf16.mxu1 %v3922_v27  ;;  %v4829_v27 = vld [vmem:[#allocation30_spill] sm:$0xff] }
 0x209   : > { %1441 = vmatpush1.bf16.msra.mxu0 %v3936_v32  ;;  %1484 = vmatpush1.bf16.msra.mxu1 %v3934_v31  ;;  %v4830_v31 = vld [vmem:[#allocation31_spill] sm:$0xff] }
 0x20a   : > { %1442 = vmatprep.subr.bf16.mxu0 %v3942_v34  ;;  %1485 = vmatprep.subr.bf16.mxu1 %v3940_v33 }
 0x20d   : > { %1443 = vmatpush1.bf16.msra.mxu0 %v3948_v37  ;;  %1486 = vmatpush1.bf16.msra.mxu1 %v3946_v36 }
 0x20e   : > { %1444 = vmatprep.subr.bf16.mxu0 %v3954_v39  ;;  %1487 = vmatprep.subr.bf16.mxu1 %v3950_v38  ;;  %v4831_v38 = vld [vmem:[#allocation28_spill] sm:$0xff] }
 0x211   : > { %1445 = vmatpush1.bf16.msra.mxu0 %v3966_v43  ;;  %1488 = vmatpush1.bf16.msra.mxu1 %v3962_v42  ;;  %v4832_v42 = vld [vmem:[#allocation29_spill] sm:$0xff] }
 0x212   : > { %1446 = vmatprep.subr.bf16.mxu0 %v3972_v45  ;;  %1489 = vmatprep.subr.bf16.mxu1 %v3970_v44 }
 0x215   : > { %1447 = vmatpush1.bf16.msra.mxu0 %v3978_v48  ;;  %1490 = vmatpush1.bf16.msra.mxu1 %v3976_v47  ;;  %v4833_v48 = vld [vmem:[#allocation32_spill] sm:$0xff] }
 0x216   : > { %1448 = vmatprep.subr.bf16.mxu0 %v3984_v50  ;;  %1491 = vmatprep.subr.bf16.mxu1 %v3982_v49  ;;  %v4834_v50 = vld [vmem:[#allocation33_spill] sm:$0xff] }
 0x219   : > { %1449 = vmatpush1.bf16.msra.mxu0 %v3996_v54  ;;  %1492 = vmatpush1.bf16.msra.mxu1 %v3994_v53 }
 0x21a   : > { %1614 = vmatprep.subr.bf16.mxu0 %v4306_v13  ;;  %1657 = vmatprep.subr.bf16.mxu1 %v4309_v15 }
 0x2cf   : > { %v1288_v17 = vpop.f32.mrb[36].mxu0  ;;  %v1331_v19 = vpop.f32.mrb[36].mxu1 }
 0x2d0   : > { %v1340_v21 = vadd.f32 %v1288_v17, %v4827_v20  ;;  %v1342_v23 = vadd.f32 %v1331_v19, %v4828_v22  ;;  %v1290_v25 = vpop.f32.mrb[37].mxu0  ;;  %v1333_v26 = vpop.f32.mrb[37].mxu1 }
 0x2d1   : > { %v1341_v28 = vadd.f32 %v1290_v25, %v4829_v27  ;;  %v1343_v32 = vadd.f32 %v1333_v26, %v4830_v31  ;;  %v1292_v33 = vpop.f32.mrb[38].mxu0  ;;  %v1335_v34 = vpop.f32.mrb[38].mxu1 }
 0x2d2   : > { %v2793_v36 = vmul.f32 -1.442695, %v1340_v21  ;;  %v2795_v37 = vmul.f32 -1.442695, %v1342_v23  ;;  %v1344_v39 = vadd.f32 %v1292_v33, %v4831_v38  ;;  %v1346_v43 = vadd.f32 %v1335_v34, %v4832_v42  ;;  %v1294_v44 = vpop.f32.mrb[39].mxu0  ;;  %v1337_v45 = vpop.f32.mrb[39].mxu1 }
 0x2d3   : > { %v2794_v47 = vmul.f32 -1.442695, %v1341_v28  ;;  %v1345_v49 = vadd.f32 %v1294_v44, %v4833_v48  ;;  %v1347_v53 = vadd.f32 %v1337_v45, %v4834_v50  ;;  %v2796_v35 = vmul.f32 -1.442695, %v1343_v32  ;;  %v4337_v38 = vld [vmem:[#allocation8 + $0x2c] ss:$16 sps:$4 sm:$0xff]  }
 0x2d4   : > { %3063 = vpow2.f32 %v2793_v36  ;;  %v2797_v54 = vmul.f32 -1.442695, %v1344_v39  ;;  %v2799_v12 = vmul.f32 -1.442695, %v1346_v43  ;;  %v4328_v36 = vld [vmem:[#allocation8] ss:$16 sps:$4 sm:$0xff]  }
 0x2d5   : > { %3065 = vpow2.f32 %v2795_v37  ;;  %v2798_v30 = vmul.f32 -1.442695, %v1345_v49  ;;  %v2800_v9 = vmul.f32 -1.442695, %v1347_v53  ;;  %v4334_v37 = vld [vmem:[#allocation8 + $0x24] ss:$16 sps:$4 sm:$0xff]  }
 0x2d6   : > { %3067 = vpow2.f32 %v2794_v47  ;;  %v4342_v39 = vld [vmem:[#allocation8 + $0x20] ss:$16 sps:$4 sm:$0xff]   ;;  %v4345_v42 = vld [vmem:[#allocation8 + $0x28] ss:$16 sps:$4 sm:$0xff]   ;;  %v4348_v43 = vld [vmem:[#allocation8 + $0x44] ss:$16 sps:$4 sm:$0xff]  }
 0x2d7   : > { %3069 = vpow2.f32 %v2797_v54  ;;  %v4351_v44 = vld [vmem:[#allocation8 + $0x4c] ss:$16 sps:$4 sm:$0xff]   ;;  %v4354_v45 = vld [vmem:[#allocation8 + $0x40] ss:$16 sps:$4 sm:$0xff]   ;;  %v4357_v47 = vld [vmem:[#allocation8 + $0x48] ss:$16 sps:$4 sm:$0xff]  }
 0x2d8   : > { %3071 = vpow2.f32 %v2799_v12  ;;  %v4360_v48 = vld [vmem:[#allocation8 + $0x64] ss:$16 sps:$4 sm:$0xff]   ;;  %v4363_v49 = vld [vmem:[#allocation8 + $0x6c] ss:$16 sps:$4 sm:$0xff]   ;;  %v4366_v50 = vld [vmem:[#allocation8 + $0x60] ss:$16 sps:$4 sm:$0xff]  }
 0x2d9   : > { %3073 = vpow2.f32 %v2798_v30  ;;  %v4369_v53 = vld [vmem:[#allocation8 + $0x68] ss:$16 sps:$4 sm:$0xff]   ;;  %v4372_v54 = vld [vmem:[#allocation8 + $0x84] ss:$16 sps:$4 sm:$0xff]   ;;  %v4375_v12 = vld [vmem:[#allocation8 + $0x8c] ss:$16 sps:$4 sm:$0xff]  }
 0x2da   : > { %v4378_v30 = vld [vmem:[#allocation8 + $0x80] ss:$16 sps:$4 sm:$0xff]  }
 0x2de   : > { %v3064_v59 = vpop.eup %3063 }
 0x2df   : > { %v3066_v55 = vpop.eup %3065  ;;  %v1372_v14 = vadd.f32 1.0, %v3064_v59  ;;  %v4381_v59 = vld [vmem:[#allocation8 + $0x88] ss:$16 sps:$4 sm:$0xff]  }
 0x2e0   : > { %v3068_v40 = vpop.eup %3067  ;;  %v1374_v62 = vadd.f32 1.0, %v3066_v55  ;;  %v4384_v55 = vld [vmem:[#allocation8 + $0xa4] ss:$16 sps:$4 sm:$0xff]  }
 0x2e1   : > { %v1373_v60 = vadd.f32 1.0, %v3068_v40  ;;  %v3070_v0 = vpop.eup %3069  ;;  %v4390_v40 = vld [vmem:[#allocation8 + $0xa0] ss:$16 sps:$4 sm:$0xff]  }
 0x2e2   : > { %3075 = vrcp.f32 %v1374_v62  ;;  %v3072_v41 = vpop.eup %3071  ;;  %v1376_v1 = vadd.f32 1.0, %v3070_v0  ;;  %v4393_v62 = vld [vmem:[#allocation8 + $0xa8] ss:$16 sps:$4 sm:$0xff]   ;;  %v4402_v0 = vld [vmem:[#allocation8 + $0xc0] ss:$16 sps:$4 sm:$0xff]  }
 0x2e3   : > { %3077 = vpow2.f32 %v2796_v35  ;;  %v3074_v24 = vpop.eup %3073  ;;  %v1378_v51 = vadd.f32 1.0, %v3072_v41  ;;  %v4387_v35 = vld [vmem:[#allocation8 + $0xac] ss:$16 sps:$4 sm:$0xff]   ;;  %v4405_v41 = vld [vmem:[#allocation8 + $0xc8] ss:$16 sps:$4 sm:$0xff]  }
 0x2e4   : > { %3079 = vrcp.f32 %v1373_v60  ;;  %v1377_v52 = vadd.f32 1.0, %v3074_v24  ;;  %v4399_v60 = vld [vmem:[#allocation8 + $0xcc] ss:$16 sps:$4 sm:$0xff]  }
 0x2e5   : > { %3081 = vrcp.f32 %v1372_v14  ;;  %v4396_v14 = vld [vmem:[#allocation8 + $0xc4] ss:$16 sps:$4 sm:$0xff]   ;;  %v4411_v24 = vld [vmem:[#allocation8 + $0xec] ss:$16 sps:$4 sm:$0xff]  }
 0x2e6   : > { %3083 = vrcp.f32 %v1378_v51  ;;  %v4414_v51 = vld [vmem:[#allocation8 + $0xe0] ss:$16 sps:$4 sm:$0xff]  }
 0x2e7   : > { %3085 = vpow2.f32 %v2800_v9  ;;  %v4408_v9 = vld [vmem:[#allocation8 + $0xe4] ss:$16 sps:$4 sm:$0xff]  }
 0x2e8   : > { %3087 = vrcp.f32 %v1377_v52  ;;  %v4417_v52 = vld [vmem:[#allocation8 + $0xe8] ss:$16 sps:$4 sm:$0xff]  }
 0x2e9   : > { %3089 = vrcp.f32 %v1376_v1 }
 0x2ec   : > { %v3076_v8 = vpop.eup %3075 }
 0x2ed   : > { %v3078_v5 = vpop.eup %3077  ;;  %v1396_v6 = vmul.f32 2.0, %v3076_v8 }
 0x2ee   : > { %v3080_v4 = vpop.eup %3079  ;;  %v1375_v17 = vadd.f32 1.0, %v3078_v5  ;;  %v4835_v5 = vld [vmem:[#allocation34_spill] sm:$0xff] }
 0x2ef   : > { %v3082_v29 = vpop.eup %3081  ;;  %v2801_v16 = vadd.f32 -1.0, %v1396_v6  ;;  %v1400_v61 = vmul.f32 %v3080_v4, %v4268_v2  ;;  %v4836_v4 = vld [vmem:[#allocation35_spill] sm:$0xff] }
 0x2f0   : > { %v3084_v18 = vpop.eup %3083  ;;  %3091 = vrcp.f32 %v1375_v17 }
 0x2f1   : > { %v3086_v11 = vpop.eup %3085  ;;  %v1402_v57 = vmul.f32 %v3082_v29, %v2801_v16  ;;  %v1397_v10 = vmul.f32 2.0, %v3084_v18 }
 0x2f2   : > { %v3088_v46 = vpop.eup %3087  ;;  %v1379_v22 = vadd.f32 1.0, %v3086_v11  ;;  %v4837_v11 = vld [vmem:[#allocation38_spill] sm:$0xff] }
 0x2f3   : > { %v4321_v19 = vadd.f32 %v1402_v57, %v1400_v61  ;;  %v2802_v20 = vadd.f32 -1.0, %v1397_v10  ;;  %v3090_v21 = vpop.eup %3089  ;;  %v1401_v25 = vmul.f32 %v3088_v46, %v4271_v56  ;;  %v4331_v56 = vld [vmem:[#allocation8 + $0x8] ss:$16 sps:$4 sm:$0xff]  }
 0x2f4   : > { %v4838_v61 = vld [vmem:[#allocation39_spill] sm:$0xff] }
 0x2f5   : > { %v1403_v23 = vmul.f32 %v3090_v21, %v2802_v20  ;;  %3093 = vtanh.f32 %v4321_v19 }
 0x2f6   : > { %3095 = vrcp.f32 %v1379_v22  ;;  %v4839_v22 = vld [vmem:[#allocation36_spill] sm:$0xff] }
 0x2f7   : > { %v4325_v26 = vadd.f32 %v1403_v23, %v1401_v25  ;;  %v4840_v25 = vld [vmem:[#allocation37_spill] sm:$0xff] }
 0x2f9   : > { %3097 = vtanh.f32 %v4325_v26 }
 0x2fa   : > { %v3092_v2 = vpop.eup %3091 }
 0x2ff   : > { %v3094_v27 = vpop.eup %3093 }
 0x300   : > { %v3096_v28 = vpop.eup %3095  ;;  %v1408_v32 = vmul.f32 %v3094_v27, %v3092_v2 }
 0x303   : > { %v3098_v31 = vpop.eup %3097 }
 0x304   : > { %v1409_v33 = vmul.f32 %v3098_v31, %v3096_v28 }
 0x306   : > { %v1433_v34 = vpack.c.bf16 %v1409_v33, %v1408_v32  ;;  %v4841_v32 = vld [vmem:[#allocation40_spill] sm:$0xff] }
 0x308   : > { %1467 = vmatmul.mubr.bf16.vlgmr.msra.gmra.mrb[40].mxu0 %v1433_v34  ;;  %1510 = vmatmul.mubr.bf16.vlgmr.msra.gmra.mrb[40].mxu1 %v1433_v34  ;;  %v4842_v34 = vld [vmem:[#allocation41_spill] sm:$0xff] }
 0x309   : > { %1615 = vmatpush1.bf16.msra.mxu0 %v4328_v36  ;;  %1658 = vmatpush1.bf16.msra.mxu1 %v4331_v56 }
 0x30a   : > { %1616 = vmatprep.subr.bf16.mxu0 %v4334_v37  ;;  %1659 = vmatprep.subr.bf16.mxu1 %v4337_v38 }
 0x30b   : > { %1646 = vmatprep.mubr.bf16.mxu0 %v4826_v63  ;;  %1689 = vmatprep.mubr.bf16.mxu1 %v4826_v63 }
 0x30d   : > { %1617 = vmatpush1.bf16.msra.mxu0 %v4342_v39  ;;  %1660 = vmatpush1.bf16.msra.mxu1 %v4345_v42 }
 0x30e   : > { %1618 = vmatprep.subr.bf16.mxu0 %v4348_v43  ;;  %1661 = vmatprep.subr.bf16.mxu1 %v4351_v44 }
 0x311   : > { %1619 = vmatpush1.bf16.msra.mxu0 %v4354_v45  ;;  %1662 = vmatpush1.bf16.msra.mxu1 %v4357_v47 }
 0x312   : > { %1620 = vmatprep.subr.bf16.mxu0 %v4360_v48  ;;  %1663 = vmatprep.subr.bf16.mxu1 %v4363_v49 }
 0x315   : > { %1621 = vmatpush1.bf16.msra.mxu0 %v4366_v50  ;;  %1664 = vmatpush1.bf16.msra.mxu1 %v4369_v53 }
 0x316   : > { %1622 = vmatprep.subr.bf16.mxu0 %v4372_v54  ;;  %1665 = vmatprep.subr.bf16.mxu1 %v4375_v12 }
 0x319   : > { %1623 = vmatpush1.bf16.msra.mxu0 %v4378_v30  ;;  %1666 = vmatpush1.bf16.msra.mxu1 %v4381_v59 }
 0x31a   : > { %1624 = vmatprep.subr.bf16.mxu0 %v4384_v55  ;;  %1667 = vmatprep.subr.bf16.mxu1 %v4387_v35 }
 0x31d   : > { %1625 = vmatpush1.bf16.msra.mxu0 %v4390_v40  ;;  %1668 = vmatpush1.bf16.msra.mxu1 %v4393_v62 }
 0x31e   : > { %1626 = vmatprep.subr.bf16.mxu0 %v4396_v14  ;;  %1669 = vmatprep.subr.bf16.mxu1 %v4399_v60 }
 0x321   : > { %1627 = vmatpush1.bf16.msra.mxu0 %v4402_v0  ;;  %1670 = vmatpush1.bf16.msra.mxu1 %v4405_v41 }
 0x322   : > { %1628 = vmatprep.subr.bf16.mxu0 %v4408_v9  ;;  %1671 = vmatprep.subr.bf16.mxu1 %v4411_v24 }
 0x325   : > { %1629 = vmatpush1.bf16.msra.mxu0 %v4414_v51  ;;  %1672 = vmatpush1.bf16.msra.mxu1 %v4417_v52 }
 0x326   : > { %1794 = vmatprep.subr.bf16.mxu0 %v4306_v13  ;;  %1837 = vmatprep.subr.bf16.mxu1 %v4309_v15 }
 0x3db   : > { %v1468_v1 = vpop.f32.mrb[40].mxu0  ;;  %v1511_v8 = vpop.f32.mrb[40].mxu1 }
 0x3dc   : > { %v1520_v6 = vadd.f32 %v1468_v1, %v4835_v5  ;;  %v1522_v29 = vadd.f32 %v1511_v8, %v4836_v4  ;;  %v1470_v16 = vpop.f32.mrb[41].mxu0  ;;  %v1513_v18 = vpop.f32.mrb[41].mxu1 }
 0x3dd   : > { %v1521_v57 = vadd.f32 %v1470_v16, %v4837_v11  ;;  %v1523_v10 = vadd.f32 %v1513_v18, %v4838_v61  ;;  %v1472_v46 = vpop.f32.mrb[42].mxu0  ;;  %v1515_v17 = vpop.f32.mrb[42].mxu1 }
 0x3de   : > { %v2803_v20 = vmul.f32 -1.442695, %v1520_v6  ;;  %v2805_v21 = vmul.f32 -1.442695, %v1522_v29  ;;  %v1524_v23 = vadd.f32 %v1472_v46, %v4839_v22  ;;  %v1526_v2 = vadd.f32 %v1515_v17, %v4840_v25  ;;  %v1474_v27 = vpop.f32.mrb[43].mxu0  ;;  %v1517_v28 = vpop.f32.mrb[43].mxu1 }
 0x3df   : > { %v2804_v31 = vmul.f32 -1.442695, %v1521_v57  ;;  %v1525_v33 = vadd.f32 %v1474_v27, %v4841_v32  ;;  %v1527_v1 = vadd.f32 %v1517_v28, %v4842_v34  ;;  %v2806_v16 = vmul.f32 -1.442695, %v1523_v10 }
 0x3e0   : > { %3099 = vpow2.f32 %v2803_v20  ;;  %v2807_v8 = vmul.f32 -1.442695, %v1524_v23  ;;  %v2809_v5 = vmul.f32 -1.442695, %v1526_v2 }
 0x3e1   : > { %3101 = vpow2.f32 %v2805_v21  ;;  %v2808_v4 = vmul.f32 -1.442695, %v1525_v33  ;;  %v2810_v20 = vmul.f32 -1.442695, %v1527_v1 }
 0x3e2   : > { %3103 = vpow2.f32 %v2804_v31 }
 0x3e3   : > { %3105 = vpow2.f32 %v2807_v8 }
 0x3e4   : > { %3107 = vpow2.f32 %v2809_v5 }
 0x3e5   : > { %3109 = vpow2.f32 %v2808_v4 }
 0x3ea   : > { %v3100_v6 = vpop.eup %3099 }
 0x3eb   : > { %v3102_v29 = vpop.eup %3101  ;;  %v1552_v61 = vadd.f32 1.0, %v3100_v6 }
 0x3ec   : > { %v3104_v18 = vpop.eup %3103  ;;  %v1554_v11 = vadd.f32 1.0, %v3102_v29 }
 0x3ed   : > { %v1553_v57 = vadd.f32 1.0, %v3104_v18  ;;  %v3106_v46 = vpop.eup %3105 }
 0x3ee   : > { %3111 = vrcp.f32 %v1554_v11  ;;  %v3108_v17 = vpop.eup %3107  ;;  %v1556_v25 = vadd.f32 1.0, %v3106_v46 }
 0x3ef   : > { %3113 = vpow2.f32 %v2806_v16  ;;  %v3110_v22 = vpop.eup %3109  ;;  %v1558_v21 = vadd.f32 1.0, %v3108_v17 }
 0x3f0   : > { %3115 = vrcp.f32 %v1553_v57  ;;  %v1557_v23 = vadd.f32 1.0, %v3110_v22 }
 0x3f1   : > { %3117 = vrcp.f32 %v1552_v61 }
 0x3f2   : > { %3119 = vrcp.f32 %v1558_v21 }
 0x3f3   : > { %3121 = vpow2.f32 %v2810_v20 }
 0x3f4   : > { %3123 = vrcp.f32 %v1557_v23 }
 0x3f5   : > { %3125 = vrcp.f32 %v1556_v25 }
 0x3f8   : > { %v3112_v10 = vpop.eup %3111 }
 0x3f9   : > { %v3114_v2 = vpop.eup %3113  ;;  %v1576_v27 = vmul.f32 2.0, %v3112_v10 }
 0x3fa   : > { %v3116_v28 = vpop.eup %3115  ;;  %v1555_v6 = vadd.f32 1.0, %v3114_v2  ;;  %v4843_v2 = vld [vmem:[#allocation42_spill] sm:$0xff] }
 0x3fb   : > { %v3118_v31 = vpop.eup %3117  ;;  %v2811_v32 = vadd.f32 -1.0, %v1576_v27  ;;  %v1580_v1 = vmul.f32 %v3116_v28, %v4321_v19  ;;  %v4844_v28 = vld [vmem:[#allocation43_spill] sm:$0xff] }
 0x3fc   : > { %v3120_v33 = vpop.eup %3119  ;;  %3127 = vrcp.f32 %v1555_v6 }
 0x3fd   : > { %v3122_v34 = vpop.eup %3121  ;;  %v1582_v8 = vmul.f32 %v3118_v31, %v2811_v32  ;;  %v1577_v5 = vmul.f32 2.0, %v3120_v33 }
 0x3fe   : > { %v3124_v4 = vpop.eup %3123  ;;  %v1559_v11 = vadd.f32 1.0, %v3122_v34  ;;  %v4845_v34 = vld [vmem:[#allocation46_spill] sm:$0xff] }
 0x3ff   : > { %v4431_v29 = vadd.f32 %v1582_v8, %v1580_v1  ;;  %v2812_v16 = vadd.f32 -1.0, %v1577_v5  ;;  %v3126_v18 = vpop.eup %3125  ;;  %v1581_v57 = vmul.f32 %v3124_v4, %v4325_v26  ;;  %v4846_v1 = vld [vmem:[#allocation47_spill] sm:$0xff] }
 0x401   : > { %v1583_v61 = vmul.f32 %v3126_v18, %v2812_v16  ;;  %3129 = vtanh.f32 %v4431_v29 }
 0x402   : > { %3131 = vrcp.f32 %v1559_v11  ;;  %v4847_v11 = vld [vmem:[#allocation44_spill] sm:$0xff] }
 0x403   : > { %v4435_v46 = vadd.f32 %v1583_v61, %v1581_v57  ;;  %v4848_v57 = vld [vmem:[#allocation45_spill] sm:$0xff] }
 0x405   : > { %3133 = vtanh.f32 %v4435_v46 }
 0x406   : > { %v3128_v19 = vpop.eup %3127 }
 0x40b   : > { %v3130_v17 = vpop.eup %3129 }
 0x40c   : > { %v3132_v20 = vpop.eup %3131  ;;  %v1588_v21 = vmul.f32 %v3130_v17, %v3128_v19 }
 0x40f   : > { %v3134_v22 = vpop.eup %3133 }
 0x410   : > { %v1589_v23 = vmul.f32 %v3134_v22, %v3132_v20 }
 0x412   : > { %v1613_v25 = vpack.c.bf16 %v1589_v23, %v1588_v21  ;;  %v4849_v21 = vld [vmem:[#allocation48_spill] sm:$0xff] }
 0x414   : > { %1647 = vmatmul.mubr.bf16.vlgmr.msra.gmra.mrb[44].mxu0 %v1613_v25  ;;  %1690 = vmatmul.mubr.bf16.vlgmr.msra.gmra.mrb[44].mxu1 %v1613_v25  ;;  %v4850_v25 = vld [vmem:[#allocation49_spill] sm:$0xff] }
 0x415   : > { %1795 = vmatpush1.bf16.msra.mxu0 %v4328_v36  ;;  %1838 = vmatpush1.bf16.msra.mxu1 %v4331_v56 }
 0x416   : > { %1796 = vmatprep.subr.bf16.mxu0 %v4334_v37  ;;  %1839 = vmatprep.subr.bf16.mxu1 %v4337_v38 }
 0x417   : > { %1826 = vmatprep.mubr.bf16.mxu0 %v4826_v63  ;;  %1869 = vmatprep.mubr.bf16.mxu1 %v4826_v63 }
 0x419   : > { %1797 = vmatpush1.bf16.msra.mxu0 %v4342_v39  ;;  %1840 = vmatpush1.bf16.msra.mxu1 %v4345_v42 }
 0x41a   : > { %1798 = vmatprep.subr.bf16.mxu0 %v4348_v43  ;;  %1841 = vmatprep.subr.bf16.mxu1 %v4351_v44 }
 0x41d   : > { %1799 = vmatpush1.bf16.msra.mxu0 %v4354_v45  ;;  %1842 = vmatpush1.bf16.msra.mxu1 %v4357_v47 }
 0x41e   : > { %1800 = vmatprep.subr.bf16.mxu0 %v4360_v48  ;;  %1843 = vmatprep.subr.bf16.mxu1 %v4363_v49 }
 0x421   : > { %1801 = vmatpush1.bf16.msra.mxu0 %v4366_v50  ;;  %1844 = vmatpush1.bf16.msra.mxu1 %v4369_v53 }
 0x422   : > { %1802 = vmatprep.subr.bf16.mxu0 %v4372_v54  ;;  %1845 = vmatprep.subr.bf16.mxu1 %v4375_v12 }
 0x425   : > { %1803 = vmatpush1.bf16.msra.mxu0 %v4378_v30  ;;  %1846 = vmatpush1.bf16.msra.mxu1 %v4381_v59 }
 0x426   : > { %1804 = vmatprep.subr.bf16.mxu0 %v4384_v55  ;;  %1847 = vmatprep.subr.bf16.mxu1 %v4387_v35 }
 0x429   : > { %1805 = vmatpush1.bf16.msra.mxu0 %v4390_v40  ;;  %1848 = vmatpush1.bf16.msra.mxu1 %v4393_v62 }
 0x42a   : > { %1806 = vmatprep.subr.bf16.mxu0 %v4396_v14  ;;  %1849 = vmatprep.subr.bf16.mxu1 %v4399_v60 }
 0x42d   : > { %1807 = vmatpush1.bf16.msra.mxu0 %v4402_v0  ;;  %1850 = vmatpush1.bf16.msra.mxu1 %v4405_v41 }
 0x42e   : > { %1808 = vmatprep.subr.bf16.mxu0 %v4408_v9  ;;  %1851 = vmatprep.subr.bf16.mxu1 %v4411_v24 }
 0x431   : > { %1809 = vmatpush1.bf16.msra.mxu0 %v4414_v51  ;;  %1852 = vmatpush1.bf16.msra.mxu1 %v4417_v52 }
 0x432   : > { %1974 = vmatprep.subr.bf16.mxu0 %v4306_v13  ;;  %2017 = vmatprep.subr.bf16.mxu1 %v4309_v15 }
 0x4e7   : > { %v1648_v26 = vpop.f32.mrb[44].mxu0  ;;  %v1691_v10 = vpop.f32.mrb[44].mxu1 }
 0x4e8   : > { %v1700_v27 = vadd.f32 %v1648_v26, %v4843_v2  ;;  %v1702_v31 = vadd.f32 %v1691_v10, %v4844_v28  ;;  %v1650_v32 = vpop.f32.mrb[45].mxu0  ;;  %v1693_v33 = vpop.f32.mrb[45].mxu1 }
 0x4e9   : > { %v1701_v8 = vadd.f32 %v1650_v32, %v4845_v34  ;;  %v1703_v5 = vadd.f32 %v1693_v33, %v4846_v1  ;;  %v1652_v4 = vpop.f32.mrb[46].mxu0  ;;  %v1695_v6 = vpop.f32.mrb[46].mxu1 }
 0x4ea   : > { %v2813_v16 = vmul.f32 -1.442695, %v1700_v27  ;;  %v2815_v18 = vmul.f32 -1.442695, %v1702_v31  ;;  %v1704_v61 = vadd.f32 %v1652_v4, %v4847_v11  ;;  %v1706_v19 = vadd.f32 %v1695_v6, %v4848_v57  ;;  %v1654_v17 = vpop.f32.mrb[47].mxu0  ;;  %v1697_v20 = vpop.f32.mrb[47].mxu1 }
 0x4eb   : > { %v2814_v22 = vmul.f32 -1.442695, %v1701_v8  ;;  %v1705_v23 = vadd.f32 %v1654_v17, %v4849_v21  ;;  %v1707_v26 = vadd.f32 %v1697_v20, %v4850_v25  ;;  %v2816_v32 = vmul.f32 -1.442695, %v1703_v5 }
 0x4ec   : > { %3135 = vpow2.f32 %v2813_v16  ;;  %v2817_v10 = vmul.f32 -1.442695, %v1704_v61  ;;  %v2819_v2 = vmul.f32 -1.442695, %v1706_v19 }
 0x4ed   : > { %3137 = vpow2.f32 %v2815_v18  ;;  %v2818_v28 = vmul.f32 -1.442695, %v1705_v23  ;;  %v2820_v16 = vmul.f32 -1.442695, %v1707_v26 }
 0x4ee   : > { %3139 = vpow2.f32 %v2814_v22 }
 0x4ef   : > { %3141 = vpow2.f32 %v2817_v10 }
 0x4f0   : > { %3143 = vpow2.f32 %v2819_v2 }
 0x4f1   : > { %3145 = vpow2.f32 %v2818_v28 }
 0x4f6   : > { %v3136_v27 = vpop.eup %3135 }
 0x4f7   : > { %v3138_v31 = vpop.eup %3137  ;;  %v1732_v1 = vadd.f32 1.0, %v3136_v27 }
 0x4f8   : > { %v3140_v33 = vpop.eup %3139  ;;  %v1734_v34 = vadd.f32 1.0, %v3138_v31 }
 0x4f9   : > { %v1733_v8 = vadd.f32 1.0, %v3140_v33  ;;  %v3142_v4 = vpop.eup %3141 }
 0x4fa   : > { %3147 = vrcp.f32 %v1734_v34  ;;  %v3144_v6 = vpop.eup %3143  ;;  %v1736_v57 = vadd.f32 1.0, %v3142_v4 }
 0x4fb   : > { %3149 = vpow2.f32 %v2816_v32  ;;  %v3146_v11 = vpop.eup %3145  ;;  %v1738_v18 = vadd.f32 1.0, %v3144_v6 }
 0x4fc   : > { %3151 = vrcp.f32 %v1733_v8  ;;  %v1737_v61 = vadd.f32 1.0, %v3146_v11 }
 0x4fd   : > { %3153 = vrcp.f32 %v1732_v1 }
 0x4fe   : > { %3155 = vrcp.f32 %v1738_v18 }
 0x4ff   : > { %3157 = vpow2.f32 %v2820_v16 }
 0x500   : > { %3159 = vrcp.f32 %v1737_v61 }
 0x501   : > { %3161 = vrcp.f32 %v1736_v57 }
 0x504   : > { %v3148_v5 = vpop.eup %3147 }
 0x505   : > { %v3150_v19 = vpop.eup %3149  ;;  %v1756_v17 = vmul.f32 2.0, %v3148_v5 }
 0x506   : > { %v3152_v20 = vpop.eup %3151  ;;  %v1735_v27 = vadd.f32 1.0, %v3150_v19  ;;  %v4851_v19 = vld [vmem:[#allocation50_spill] sm:$0xff] }
 0x507   : > { %v3154_v22 = vpop.eup %3153  ;;  %v2821_v21 = vadd.f32 -1.0, %v1756_v17  ;;  %v1760_v26 = vmul.f32 %v3152_v20, %v4431_v29  ;;  %v4852_v20 = vld [vmem:[#allocation51_spill] sm:$0xff] }
 0x508   : > { %v3156_v23 = vpop.eup %3155  ;;  %3163 = vrcp.f32 %v1735_v27 }
 0x509   : > { %v3158_v25 = vpop.eup %3157  ;;  %v1762_v10 = vmul.f32 %v3154_v22, %v2821_v21  ;;  %v1757_v2 = vmul.f32 2.0, %v3156_v23 }
 0x50a   : > { %v3160_v28 = vpop.eup %3159  ;;  %v1739_v34 = vadd.f32 1.0, %v3158_v25  ;;  %v4853_v25 = vld [vmem:[#allocation54_spill] sm:$0xff] }
 0x50b   : > { %v4481_v31 = vadd.f32 %v1762_v10, %v1760_v26  ;;  %v2822_v32 = vadd.f32 -1.0, %v1757_v2  ;;  %v3162_v33 = vpop.eup %3161  ;;  %v1761_v8 = vmul.f32 %v3160_v28, %v4435_v46  ;;  %v4854_v26 = vld [vmem:[#allocation55_spill] sm:$0xff] }
 0x50d   : > { %v1763_v1 = vmul.f32 %v3162_v33, %v2822_v32  ;;  %3165 = vtanh.f32 %v4481_v31 }
 0x50e   : > { %3167 = vrcp.f32 %v1739_v34  ;;  %v4855_v34 = vld [vmem:[#allocation52_spill] sm:$0xff] }
 0x50f   : > { %v4485_v4 = vadd.f32 %v1763_v1, %v1761_v8  ;;  %v4856_v8 = vld [vmem:[#allocation53_spill] sm:$0xff] }
 0x511   : > { %3169 = vtanh.f32 %v4485_v4 }
 0x512   : > { %v3164_v29 = vpop.eup %3163 }
 0x517   : > { %v3166_v6 = vpop.eup %3165 }
 0x518   : > { %v3168_v16 = vpop.eup %3167  ;;  %v1768_v18 = vmul.f32 %v3166_v6, %v3164_v29 }
 0x51b   : > { %v3170_v11 = vpop.eup %3169 }
 0x51c   : > { %v1769_v61 = vmul.f32 %v3170_v11, %v3168_v16 }
 0x51e   : > { %v1793_v57 = vpack.c.bf16 %v1769_v61, %v1768_v18  ;;  %v4857_v18 = vld [vmem:[#allocation56_spill] sm:$0xff] }
 0x520   : > { %1827 = vmatmul.mubr.bf16.vlgmr.msra.gmra.mrb[48].mxu0 %v1793_v57  ;;  %1870 = vmatmul.mubr.bf16.vlgmr.msra.gmra.mrb[48].mxu1 %v1793_v57  ;;  %v4858_v57 = vld [vmem:[#allocation57_spill] sm:$0xff] }
 0x521   : > { %1975 = vmatpush1.bf16.msra.mxu0 %v4328_v36  ;;  %2018 = vmatpush1.bf16.msra.mxu1 %v4331_v56 }
 0x522   : > { %1976 = vmatprep.subr.bf16.mxu0 %v4334_v37  ;;  %2019 = vmatprep.subr.bf16.mxu1 %v4337_v38 }
 0x523   : > { %2006 = vmatprep.mubr.bf16.mxu0 %v4826_v63  ;;  %2049 = vmatprep.mubr.bf16.mxu1 %v4826_v63 }
 0x525   : > { %1977 = vmatpush1.bf16.msra.mxu0 %v4342_v39  ;;  %2020 = vmatpush1.bf16.msra.mxu1 %v4345_v42 }
 0x526   : > { %1978 = vmatprep.subr.bf16.mxu0 %v4348_v43  ;;  %2021 = vmatprep.subr.bf16.mxu1 %v4351_v44 }
 0x529   : > { %1979 = vmatpush1.bf16.msra.mxu0 %v4354_v45  ;;  %2022 = vmatpush1.bf16.msra.mxu1 %v4357_v47 }
 0x52a   : > { %1980 = vmatprep.subr.bf16.mxu0 %v4360_v48  ;;  %2023 = vmatprep.subr.bf16.mxu1 %v4363_v49 }
 0x52d   : > { %1981 = vmatpush1.bf16.msra.mxu0 %v4366_v50  ;;  %2024 = vmatpush1.bf16.msra.mxu1 %v4369_v53 }
 0x52e   : > { %1982 = vmatprep.subr.bf16.mxu0 %v4372_v54  ;;  %2025 = vmatprep.subr.bf16.mxu1 %v4375_v12 }
 0x531   : > { %1983 = vmatpush1.bf16.msra.mxu0 %v4378_v30  ;;  %2026 = vmatpush1.bf16.msra.mxu1 %v4381_v59 }
 0x532   : > { %1984 = vmatprep.subr.bf16.mxu0 %v4384_v55  ;;  %2027 = vmatprep.subr.bf16.mxu1 %v4387_v35 }
 0x535   : > { %1985 = vmatpush1.bf16.msra.mxu0 %v4390_v40  ;;  %2028 = vmatpush1.bf16.msra.mxu1 %v4393_v62 }
 0x536   : > { %1986 = vmatprep.subr.bf16.mxu0 %v4396_v14  ;;  %2029 = vmatprep.subr.bf16.mxu1 %v4399_v60 }
 0x539   : > { %1987 = vmatpush1.bf16.msra.mxu0 %v4402_v0  ;;  %2030 = vmatpush1.bf16.msra.mxu1 %v4405_v41 }
 0x53a   : > { %1988 = vmatprep.subr.bf16.mxu0 %v4408_v9  ;;  %2031 = vmatprep.subr.bf16.mxu1 %v4411_v24 }
 0x53d   : > { %1989 = vmatpush1.bf16.msra.mxu0 %v4414_v51  ;;  %2032 = vmatpush1.bf16.msra.mxu1 %v4417_v52 }
 0x53e   : > { %2154 = vmatprep.subr.bf16.mxu0 %v4306_v13  ;;  %2197 = vmatprep.subr.bf16.mxu1 %v4309_v15 }
 0x5f3   : > { %v1828_v46 = vpop.f32.mrb[48].mxu0  ;;  %v1871_v5 = vpop.f32.mrb[48].mxu1 }
 0x5f4   : > { %v1880_v17 = vadd.f32 %v1828_v46, %v4851_v19  ;;  %v1882_v22 = vadd.f32 %v1871_v5, %v4852_v20  ;;  %v1830_v21 = vpop.f32.mrb[49].mxu0  ;;  %v1873_v23 = vpop.f32.mrb[49].mxu1 }
 0x5f5   : > { %v1881_v10 = vadd.f32 %v1830_v21, %v4853_v25  ;;  %v1883_v2 = vadd.f32 %v1873_v23, %v4854_v26  ;;  %v1832_v28 = vpop.f32.mrb[50].mxu0  ;;  %v1875_v27 = vpop.f32.mrb[50].mxu1 }
 0x5f6   : > { %v2823_v32 = vmul.f32 -1.442695, %v1880_v17  ;;  %v2825_v33 = vmul.f32 -1.442695, %v1882_v22  ;;  %v1884_v1 = vadd.f32 %v1832_v28, %v4855_v34  ;;  %v1886_v29 = vadd.f32 %v1875_v27, %v4856_v8  ;;  %v1834_v6 = vpop.f32.mrb[51].mxu0  ;;  %v1877_v16 = vpop.f32.mrb[51].mxu1 }
 0x5f7   : > { %v2824_v11 = vmul.f32 -1.442695, %v1881_v10  ;;  %v1885_v61 = vadd.f32 %v1834_v6, %v4857_v18  ;;  %v1887_v46 = vadd.f32 %v1877_v16, %v4858_v57  ;;  %v2826_v21 = vmul.f32 -1.442695, %v1883_v2 }
 0x5f8   : > { %3171 = vpow2.f32 %v2823_v32  ;;  %v2827_v5 = vmul.f32 -1.442695, %v1884_v1  ;;  %v2829_v19 = vmul.f32 -1.442695, %v1886_v29 }
 0x5f9   : > { %3173 = vpow2.f32 %v2825_v33  ;;  %v2828_v20 = vmul.f32 -1.442695, %v1885_v61  ;;  %v2830_v32 = vmul.f32 -1.442695, %v1887_v46 }
 0x5fa   : > { %3175 = vpow2.f32 %v2824_v11 }
 0x5fb   : > { %3177 = vpow2.f32 %v2827_v5 }
 0x5fc   : > { %3179 = vpow2.f32 %v2829_v19 }
 0x5fd   : > { %3181 = vpow2.f32 %v2828_v20 }
 0x602   : > { %v3172_v17 = vpop.eup %3171 }
 0x603   : > { %v3174_v22 = vpop.eup %3173  ;;  %v1912_v26 = vadd.f32 1.0, %v3172_v17 }
 0x604   : > { %v3176_v23 = vpop.eup %3175  ;;  %v1914_v25 = vadd.f32 1.0, %v3174_v22 }
 0x605   : > { %v1913_v10 = vadd.f32 1.0, %v3176_v23  ;;  %v3178_v28 = vpop.eup %3177 }
 0x606   : > { %3183 = vrcp.f32 %v1914_v25  ;;  %v3180_v27 = vpop.eup %3179  ;;  %v1916_v8 = vadd.f32 1.0, %v3178_v28 }
 0x607   : > { %3185 = vpow2.f32 %v2826_v21  ;;  %v3182_v34 = vpop.eup %3181  ;;  %v1918_v33 = vadd.f32 1.0, %v3180_v27 }
 0x608   : > { %3187 = vrcp.f32 %v1913_v10  ;;  %v1917_v1 = vadd.f32 1.0, %v3182_v34 }
 0x609   : > { %3189 = vrcp.f32 %v1912_v26 }
 0x60a   : > { %3191 = vrcp.f32 %v1918_v33 }
 0x60b   : > { %3193 = vpow2.f32 %v2830_v32 }
 0x60c   : > { %3195 = vrcp.f32 %v1917_v1 }
 0x60d   : > { %3197 = vrcp.f32 %v1916_v8 }
 0x610   : > { %v3184_v2 = vpop.eup %3183 }
 0x611   : > { %v3186_v29 = vpop.eup %3185  ;;  %v1936_v6 = vmul.f32 2.0, %v3184_v2 }
 0x612   : > { %v3188_v16 = vpop.eup %3187  ;;  %v1915_v17 = vadd.f32 1.0, %v3186_v29  ;;  %v4859_v29 = vld [vmem:[#allocation58_spill] sm:$0xff] }
 0x613   : > { %v3190_v11 = vpop.eup %3189  ;;  %v2831_v18 = vadd.f32 -1.0, %v1936_v6  ;;  %v1940_v46 = vmul.f32 %v3188_v16, %v4481_v31  ;;  %v4860_v16 = vld [vmem:[#allocation59_spill] sm:$0xff] }
 0x614   : > { %v3192_v61 = vpop.eup %3191  ;;  %3199 = vrcp.f32 %v1915_v17 }
 0x615   : > { %v3194_v57 = vpop.eup %3193  ;;  %v1942_v5 = vmul.f32 %v3190_v11, %v2831_v18  ;;  %v1937_v19 = vmul.f32 2.0, %v3192_v61 }
 0x616   : > { %v3196_v20 = vpop.eup %3195  ;;  %v1919_v25 = vadd.f32 1.0, %v3194_v57  ;;  %v4861_v57 = vld [vmem:[#allocation62_spill] sm:$0xff] }
 0x617   : > { %v4531_v22 = vadd.f32 %v1942_v5, %v1940_v46  ;;  %v2832_v21 = vadd.f32 -1.0, %v1937_v19  ;;  %v3198_v23 = vpop.eup %3197  ;;  %v1941_v10 = vmul.f32 %v3196_v20, %v4485_v4  ;;  %v4862_v46 = vld [vmem:[#allocation63_spill] sm:$0xff] }
 0x619   : > { %v1943_v26 = vmul.f32 %v3198_v23, %v2832_v21  ;;  %3201 = vtanh.f32 %v4531_v22 }
 0x61a   : > { %3203 = vrcp.f32 %v1919_v25  ;;  %v4863_v25 = vld [vmem:[#allocation60_spill] sm:$0xff] }
 0x61b   : > { %v4535_v28 = vadd.f32 %v1943_v26, %v1941_v10  ;;  %v4864_v26 = vld [vmem:[#allocation61_spill] sm:$0xff] }
 0x61d   : > { %3205 = vtanh.f32 %v4535_v28 }
 0x61e   : > { %v3200_v31 = vpop.eup %3199 }
 0x623   : > { %v3202_v27 = vpop.eup %3201 }
 0x624   : > { %v3204_v32 = vpop.eup %3203  ;;  %v1948_v33 = vmul.f32 %v3202_v27, %v3200_v31 }
 0x627   : > { %v3206_v34 = vpop.eup %3205 }
 0x628   : > { %v1949_v1 = vmul.f32 %v3206_v34, %v3204_v32  ;;  %v4865_v32 = vld [vmem:[#allocation64_spill] sm:$0xff] }
 0x62a   : > { %v1973_v8 = vpack.c.bf16 %v1949_v1, %v1948_v33  ;;  %v4866_v33 = vld [vmem:[#allocation65_spill] sm:$0xff] }
 0x62c   : > { %2007 = vmatmul.mubr.bf16.vlgmr.msra.gmra.mrb[52].mxu0 %v1973_v8  ;;  %2050 = vmatmul.mubr.bf16.vlgmr.msra.gmra.mrb[52].mxu1 %v1973_v8 }
 0x62d   : > { %2155 = vmatpush1.bf16.msra.mxu0 %v4328_v36  ;;  %2198 = vmatpush1.bf16.msra.mxu1 %v4331_v56 }
 0x62e   : > { %2156 = vmatprep.subr.bf16.mxu0 %v4334_v37  ;;  %2199 = vmatprep.subr.bf16.mxu1 %v4337_v38 }
 0x62f   : > { %2186 = vmatprep.mubr.bf16.mxu0 %v4826_v63  ;;  %2229 = vmatprep.mubr.bf16.mxu1 %v4826_v63 }
 0x631   : > { %2157 = vmatpush1.bf16.msra.mxu0 %v4342_v39  ;;  %2200 = vmatpush1.bf16.msra.mxu1 %v4345_v42 }
 0x632   : > { %2158 = vmatprep.subr.bf16.mxu0 %v4348_v43  ;;  %2201 = vmatprep.subr.bf16.mxu1 %v4351_v44 }
 0x635   : > { %2159 = vmatpush1.bf16.msra.mxu0 %v4354_v45  ;;  %2202 = vmatpush1.bf16.msra.mxu1 %v4357_v47 }
 0x636   : > { %2160 = vmatprep.subr.bf16.mxu0 %v4360_v48  ;;  %2203 = vmatprep.subr.bf16.mxu1 %v4363_v49 }
 0x639   : > { %2161 = vmatpush1.bf16.msra.mxu0 %v4366_v50  ;;  %2204 = vmatpush1.bf16.msra.mxu1 %v4369_v53 }
 0x63a   : > { %2162 = vmatprep.subr.bf16.mxu0 %v4372_v54  ;;  %2205 = vmatprep.subr.bf16.mxu1 %v4375_v12 }
 0x63d   : > { %2163 = vmatpush1.bf16.msra.mxu0 %v4378_v30  ;;  %2206 = vmatpush1.bf16.msra.mxu1 %v4381_v59 }
 0x63e   : > { %2164 = vmatprep.subr.bf16.mxu0 %v4384_v55  ;;  %2207 = vmatprep.subr.bf16.mxu1 %v4387_v35 }
 0x641   : > { %2165 = vmatpush1.bf16.msra.mxu0 %v4390_v40  ;;  %2208 = vmatpush1.bf16.msra.mxu1 %v4393_v62 }
 0x642   : > { %2166 = vmatprep.subr.bf16.mxu0 %v4396_v14  ;;  %2209 = vmatprep.subr.bf16.mxu1 %v4399_v60 }
 0x645   : > { %2167 = vmatpush1.bf16.msra.mxu0 %v4402_v0  ;;  %2210 = vmatpush1.bf16.msra.mxu1 %v4405_v41 }
 0x646   : > { %2168 = vmatprep.subr.bf16.mxu0 %v4408_v9  ;;  %2211 = vmatprep.subr.bf16.mxu1 %v4411_v24 }
 0x649   : > { %2169 = vmatpush1.bf16.msra.mxu0 %v4414_v51  ;;  %2212 = vmatpush1.bf16.msra.mxu1 %v4417_v52 }
 0x64a   : > { %2334 = vmatprep.subr.bf16.mxu0 %v4306_v13  ;;  %2377 = vmatprep.subr.bf16.mxu1 %v4309_v15 }
 0x6ff   : > { %v2008_v4 = vpop.f32.mrb[52].mxu0  ;;  %v2051_v2 = vpop.f32.mrb[52].mxu1 }
 0x700   : > { %v2060_v6 = vadd.f32 %v2008_v4, %v4859_v29  ;;  %v2062_v11 = vadd.f32 %v2051_v2, %v4860_v16  ;;  %v2010_v18 = vpop.f32.mrb[53].mxu0  ;;  %v2053_v61 = vpop.f32.mrb[53].mxu1 }
 0x701   : > { %v2061_v5 = vadd.f32 %v2010_v18, %v4861_v57  ;;  %v2063_v19 = vadd.f32 %v2053_v61, %v4862_v46  ;;  %v2012_v20 = vpop.f32.mrb[54].mxu0  ;;  %v2055_v17 = vpop.f32.mrb[54].mxu1 }
 0x702   : > { %v2833_v21 = vmul.f32 -1.442695, %v2060_v6  ;;  %v2835_v23 = vmul.f32 -1.442695, %v2062_v11  ;;  %v2064_v13 = vadd.f32 %v2012_v20, %v4863_v25  ;;  %v2066_v15 = vadd.f32 %v2055_v17, %v4864_v26  ;;  %v2014_v10 = vpop.f32.mrb[55].mxu0  ;;  %v2057_v31 = vpop.f32.mrb[55].mxu1 }
 0x703   : > { %v2834_v27 = vmul.f32 -1.442695, %v2061_v5  ;;  %v2065_v34 = vadd.f32 %v2014_v10, %v4865_v32  ;;  %v2067_v1 = vadd.f32 %v2057_v31, %v4866_v33  ;;  %v2836_v16 = vmul.f32 -1.442695, %v2063_v19 }
 0x704   : > { %3207 = vpow2.f32 %v2833_v21  ;;  %v2837_v8 = vmul.f32 -1.442695, %v2064_v13  ;;  %v2839_v4 = vmul.f32 -1.442695, %v2066_v15 }
 0x705   : > { %3209 = vpow2.f32 %v2835_v23  ;;  %v2838_v2 = vmul.f32 -1.442695, %v2065_v34  ;;  %v2840_v20 = vmul.f32 -1.442695, %v2067_v1 }
 0x706   : > { %3211 = vpow2.f32 %v2834_v27 }
 0x707   : > { %3213 = vpow2.f32 %v2837_v8 }
 0x708   : > { %3215 = vpow2.f32 %v2839_v4 }
 0x709   : > { %3217 = vpow2.f32 %v2838_v2 }
 0x70e   : > { %v3208_v29 = vpop.eup %3207 }
 0x70f   : > { %v3210_v6 = vpop.eup %3209  ;;  %v2092_v61 = vadd.f32 1.0, %v3208_v29 }
 0x710   : > { %v3212_v11 = vpop.eup %3211  ;;  %v2094_v18 = vadd.f32 1.0, %v3210_v6 }
 0x711   : > { %v2093_v57 = vadd.f32 1.0, %v3212_v11  ;;  %v3214_v5 = vpop.eup %3213 }
 0x712   : > { %3219 = vrcp.f32 %v2094_v18  ;;  %v3216_v46 = vpop.eup %3215  ;;  %v2096_v25 = vadd.f32 1.0, %v3214_v5 }
 0x713   : > { %3221 = vpow2.f32 %v2836_v16  ;;  %v3218_v17 = vpop.eup %3217  ;;  %v2098_v21 = vadd.f32 1.0, %v3216_v46 }
 0x714   : > { %3223 = vrcp.f32 %v2093_v57  ;;  %v2097_v23 = vadd.f32 1.0, %v3218_v17 }
 0x715   : > { %3225 = vrcp.f32 %v2092_v61 }
 0x716   : > { %3227 = vrcp.f32 %v2098_v21 }
 0x717   : > { %3229 = vpow2.f32 %v2840_v20 }
 0x718   : > { %3231 = vrcp.f32 %v2097_v23 }
 0x719   : > { %3233 = vrcp.f32 %v2096_v25 }
 0x71c   : > { %v3220_v19 = vpop.eup %3219 }
 0x71d   : > { %v3222_v13 = vpop.eup %3221  ;;  %v2116_v26 = vmul.f32 2.0, %v3220_v19 }
 0x71e   : > { %v3224_v15 = vpop.eup %3223  ;;  %v2095_v4 = vadd.f32 1.0, %v3222_v13 }
 0x71f   : > { %v3226_v10 = vpop.eup %3225  ;;  %v2841_v31 = vadd.f32 -1.0, %v2116_v26  ;;  %v2120_v33 = vmul.f32 %v3224_v15, %v4531_v22 }
 0x720   : > { %v3228_v27 = vpop.eup %3227  ;;  %3235 = vrcp.f32 %v2095_v4 }
 0x721   : > { %v3230_v32 = vpop.eup %3229  ;;  %v2122_v34 = vmul.f32 %v3226_v10, %v2841_v31  ;;  %v2117_v1 = vmul.f32 2.0, %v3228_v27 }
 0x722   : > { %v3232_v8 = vpop.eup %3231  ;;  %v2099_v16 = vadd.f32 1.0, %v3230_v32 }
 0x723   : > { %v4581_v2 = vadd.f32 %v2122_v34, %v2120_v33  ;;  %v2842_v29 = vadd.f32 -1.0, %v2117_v1  ;;  %v3234_v6 = vpop.eup %3233  ;;  %v2121_v18 = vmul.f32 %v3232_v8, %v4535_v28 }
 0x725   : > { %v2123_v11 = vmul.f32 %v3234_v6, %v2842_v29  ;;  %3237 = vtanh.f32 %v4581_v2 }
 0x726   : > { %3239 = vrcp.f32 %v2099_v16 }
 0x727   : > { %v4585_v61 = vadd.f32 %v2123_v11, %v2121_v18 }
 0x729   : > { %3241 = vtanh.f32 %v4585_v61 }
 0x72a   : > { %v3236_v22 = vpop.eup %3235 }
 0x72f   : > { %v3238_v57 = vpop.eup %3237 }
 0x730   : > { %v3240_v5 = vpop.eup %3239  ;;  %v2128_v20 = vmul.f32 %v3238_v57, %v3236_v22 }
 0x733   : > { %v3242_v46 = vpop.eup %3241 }
 0x734   : > { %v2129_v17 = vmul.f32 %v3242_v46, %v3240_v5 }
 0x736   : > { %v2153_v21 = vpack.c.bf16 %v2129_v17, %v2128_v20 }
 0x738   : > { %2187 = vmatmul.mubr.bf16.vlgmr.msra.gmra.mrb[56].mxu0 %v2153_v21  ;;  %2230 = vmatmul.mubr.bf16.vlgmr.msra.gmra.mrb[56].mxu1 %v2153_v21 }
 0x739   : > { %2335 = vmatpush1.bf16.msra.mxu0 %v4328_v36  ;;  %2378 = vmatpush1.bf16.msra.mxu1 %v4331_v56  ;;  %v4867_v56 = vld [vmem:[#allocation66_spill] sm:$0xff] }
 0x73a   : > { %2336 = vmatprep.subr.bf16.mxu0 %v4334_v37  ;;  %2379 = vmatprep.subr.bf16.mxu1 %v4337_v38  ;;  %v4868_v38 = vld [vmem:[#allocation67_spill] sm:$0xff] }
 0x73b   : > { %2366 = vmatprep.mubr.bf16.mxu0 %v4826_v63  ;;  %2409 = vmatprep.mubr.bf16.mxu1 %v4826_v63 }
 0x73d   : > { %2337 = vmatpush1.bf16.msra.mxu0 %v4342_v39  ;;  %2380 = vmatpush1.bf16.msra.mxu1 %v4345_v42 }
 0x73e   : > { %2338 = vmatprep.subr.bf16.mxu0 %v4348_v43  ;;  %2381 = vmatprep.subr.bf16.mxu1 %v4351_v44  ;;  %v4869_v44 = vld [vmem:[#allocation70_spill] sm:$0xff] }
 0x741   : > { %2339 = vmatpush1.bf16.msra.mxu0 %v4354_v45  ;;  %2382 = vmatpush1.bf16.msra.mxu1 %v4357_v47  ;;  %v4870_v47 = vld [vmem:[#allocation71_spill] sm:$0xff] }
 0x742   : > { %2340 = vmatprep.subr.bf16.mxu0 %v4360_v48  ;;  %2383 = vmatprep.subr.bf16.mxu1 %v4363_v49 }
 0x745   : > { %2341 = vmatpush1.bf16.msra.mxu0 %v4366_v50  ;;  %2384 = vmatpush1.bf16.msra.mxu1 %v4369_v53 }
 0x746   : > { %2342 = vmatprep.subr.bf16.mxu0 %v4372_v54  ;;  %2385 = vmatprep.subr.bf16.mxu1 %v4375_v12  ;;  %v4871_v12 = vld [vmem:[#allocation68_spill] sm:$0xff] }
 0x749   : > { %2343 = vmatpush1.bf16.msra.mxu0 %v4378_v30  ;;  %2386 = vmatpush1.bf16.msra.mxu1 %v4381_v59  ;;  %v4872_v59 = vld [vmem:[#allocation69_spill] sm:$0xff] }
 0x74a   : > { %2344 = vmatprep.subr.bf16.mxu0 %v4384_v55  ;;  %2387 = vmatprep.subr.bf16.mxu1 %v4387_v35 }
 0x74d   : > { %2345 = vmatpush1.bf16.msra.mxu0 %v4390_v40  ;;  %2388 = vmatpush1.bf16.msra.mxu1 %v4393_v62 }
 0x74e   : > { %2346 = vmatprep.subr.bf16.mxu0 %v4396_v14  ;;  %2389 = vmatprep.subr.bf16.mxu1 %v4399_v60  ;;  %v4873_v14 = vld [vmem:[#allocation72_spill] sm:$0xff] }
 0x751   : > { %2347 = vmatpush1.bf16.msra.mxu0 %v4402_v0  ;;  %2390 = vmatpush1.bf16.msra.mxu1 %v4405_v41  ;;  %v4874_v0 = vld [vmem:[#allocation73_spill] sm:$0xff] }
 0x752   : > { %2348 = vmatprep.subr.bf16.mxu0 %v4408_v9  ;;  %2391 = vmatprep.subr.bf16.mxu1 %v4411_v24 }
 0x755   : > { %2349 = vmatpush1.bf16.msra.mxu0 %v4414_v51  ;;  %2392 = vmatpush1.bf16.msra.mxu1 %v4417_v52 }
 0x80b   : > { %v2188_v63 = vpop.f32.mrb[56].mxu0  ;;  %v2231_v36 = vpop.f32.mrb[56].mxu1 }
 0x80c   : > { %v2240_v37 = vadd.f32 %v2188_v63, %v4867_v56  ;;  %v2242_v39 = vadd.f32 %v2231_v36, %v4868_v38  ;;  %v2190_v42 = vpop.f32.mrb[57].mxu0  ;;  %v2233_v43 = vpop.f32.mrb[57].mxu1 }
 0x80d   : > { %v2241_v45 = vadd.f32 %v2190_v42, %v4869_v44  ;;  %v2243_v48 = vadd.f32 %v2233_v43, %v4870_v47  ;;  %v2192_v49 = vpop.f32.mrb[58].mxu0  ;;  %v2235_v50 = vpop.f32.mrb[58].mxu1 }
 0x80e   : > { %v2843_v53 = vmul.f32 -1.442695, %v2240_v37  ;;  %v2845_v54 = vmul.f32 -1.442695, %v2242_v39  ;;  %v2244_v30 = vadd.f32 %v2192_v49, %v4871_v12  ;;  %v2246_v55 = vadd.f32 %v2235_v50, %v4872_v59  ;;  %v2194_v35 = vpop.f32.mrb[59].mxu0  ;;  %v2237_v40 = vpop.f32.mrb[59].mxu1 }
 0x80f   : > { %v2844_v62 = vmul.f32 -1.442695, %v2241_v45  ;;  %v2245_v60 = vadd.f32 %v2194_v35, %v4873_v14  ;;  %v2247_v41 = vadd.f32 %v2237_v40, %v4874_v0  ;;  %v2846_v23 = vmul.f32 -1.442695, %v2243_v48  ;;  %v4876_v14 = vld [vmem:[#allocation74_spill] sm:$0xff]  ;;  %v4877_v0 = vld [vmem:[#allocation75_spill] sm:$0xff] }
 0x810   : > { %3243 = vpow2.f32 %v2843_v53  ;;  %v2847_v9 = vmul.f32 -1.442695, %v2244_v30  ;;  %v2849_v24 = vmul.f32 -1.442695, %v2246_v55  ;;  %v4875_v30 = vld [vmem:[#allocation76_spill] sm:$0xff] }
 0x811   : > { %3245 = vpow2.f32 %v2845_v54  ;;  %v2848_v51 = vmul.f32 -1.442695, %v2245_v60  ;;  %v2850_v31 = vmul.f32 -1.442695, %v2247_v41 }
 0x812   : > { %3247 = vpow2.f32 %v2844_v62 }
 0x813   : > { %3249 = vpow2.f32 %v2847_v9 }
 0x814   : > { %3251 = vpow2.f32 %v2849_v24 }
 0x815   : > { %3253 = vpow2.f32 %v2848_v51 }
 0x81a   : > { %v3244_v52 = vpop.eup %3243 }
 0x81b   : > { %v3246_v28 = vpop.eup %3245  ;;  %v2272_v13 = vadd.f32 1.0, %v3244_v52 }
 0x81c   : > { %v3248_v25 = vpop.eup %3247  ;;  %v2274_v19 = vadd.f32 1.0, %v3246_v28 }
 0x81d   : > { %v2273_v26 = vadd.f32 1.0, %v3248_v25  ;;  %v3250_v15 = vpop.eup %3249 }
 0x81e   : > { %3255 = vrcp.f32 %v2274_v19  ;;  %v3252_v10 = vpop.eup %3251  ;;  %v2276_v33 = vadd.f32 1.0, %v3250_v15 }
 0x81f   : > { %3257 = vpow2.f32 %v2846_v23  ;;  %v3254_v27 = vpop.eup %3253  ;;  %v2278_v32 = vadd.f32 1.0, %v3252_v10 }
 0x820   : > { %3259 = vrcp.f32 %v2273_v26  ;;  %v2277_v34 = vadd.f32 1.0, %v3254_v27 }
 0x821   : > { %3261 = vrcp.f32 %v2272_v13 }
 0x822   : > { %3263 = vrcp.f32 %v2278_v32 }
 0x823   : > { %3265 = vpow2.f32 %v2850_v31 }
 0x824   : > { %3267 = vrcp.f32 %v2277_v34 }
 0x825   : > { %3269 = vrcp.f32 %v2276_v33 }
 0x828   : > { %v3256_v1 = vpop.eup %3255 }
 0x829   : > { %v3258_v8 = vpop.eup %3257  ;;  %v2296_v4 = vmul.f32 2.0, %v3256_v1 }
 0x82a   : > { %v3260_v29 = vpop.eup %3259  ;;  %v2275_v20 = vadd.f32 1.0, %v3258_v8 }
 0x82b   : > { %v3262_v6 = vpop.eup %3261  ;;  %v2851_v16 = vadd.f32 -1.0, %v2296_v4  ;;  %v2300_v57 = vmul.f32 %v3260_v29, %v4581_v2 }
 0x82c   : > { %v3264_v11 = vpop.eup %3263  ;;  %3271 = vrcp.f32 %v2275_v20 }
 0x82d   : > { %v3266_v18 = vpop.eup %3265  ;;  %v2302_v22 = vmul.f32 %v3262_v6, %v2851_v16  ;;  %v2297_v5 = vmul.f32 2.0, %v3264_v11 }
 0x82e   : > { %v3268_v46 = vpop.eup %3267  ;;  %v2279_v36 = vadd.f32 1.0, %v3266_v18 }
 0x82f   : > { %v4629_v17 = vadd.f32 %v2302_v22, %v2300_v57  ;;  %v2852_v21 = vadd.f32 -1.0, %v2297_v5  ;;  %v3270_v63 = vpop.eup %3269  ;;  %v2301_v37 = vmul.f32 %v3268_v46, %v4585_v61 }
 0x831   : > { %v2303_v56 = vmul.f32 %v3270_v63, %v2852_v21  ;;  %3273 = vtanh.f32 %v4629_v17 }
 0x832   : > { %3275 = vrcp.f32 %v2279_v36 }
 0x833   : > { %v4633_v38 = vadd.f32 %v2303_v56, %v2301_v37 }
 0x835   : > { %3277 = vtanh.f32 %v4633_v38 }
 0x836   : > { %v3272_v2 = vpop.eup %3271 }
 0x83b   : > { %v3274_v39 = vpop.eup %3273 }
 0x83c   : > { %v3276_v42 = vpop.eup %3275  ;;  %v2308_v44 = vmul.f32 %v3274_v39, %v3272_v2 }
 0x83f   : > { %v3278_v43 = vpop.eup %3277 }
 0x840   : > { %v2309_v45 = vmul.f32 %v3278_v43, %v3276_v42 }
 0x842   : > { %v2333_v47 = vpack.c.bf16 %v2309_v45, %v2308_v44 }
 0x844   : > { %2367 = vmatmul.mubr.bf16.vlgmr.msra.gmra.mrb[60].mxu0 %v2333_v47  ;;  %2410 = vmatmul.mubr.bf16.vlgmr.msra.gmra.mrb[60].mxu1 %v2333_v47 }
 0x917   : > { %v2368_v48 = vpop.f32.mrb[60].mxu0  ;;  %v2411_v49 = vpop.f32.mrb[60].mxu1 }
 0x918   : > { %v2420_v61 = vadd.f32 %v2368_v48, %v4240_v3  ;;  %v2422_v50 = vadd.f32 %v2411_v49, %v4243_v58  ;;  %v2370_v53 = vpop.f32.mrb[61].mxu0  ;;  %v2413_v54 = vpop.f32.mrb[61].mxu1  ;;  %v4878_v3 = vld [vmem:[#allocation77_spill] sm:$0xff]  ;;  %v4879_v58 = vld [vmem:[#allocation78_spill] sm:$0xff] }
 0x919   : > { %v2421_v12 = vadd.f32 %v2370_v53, %v4252_v7  ;;  %v2423_v59 = vadd.f32 %v2413_v54, %v4875_v30  ;;  %v2372_v55 = vpop.f32.mrb[62].mxu0  ;;  %v2415_v35 = vpop.f32.mrb[62].mxu1 }
 0x91a   : > { %v2853_v40 = vmul.f32 -1.442695, %v2420_v61  ;;  %v2855_v62 = vmul.f32 -1.442695, %v2422_v50  ;;  %v2424_v60 = vadd.f32 %v2372_v55, %v4876_v14  ;;  %v2426_v41 = vadd.f32 %v2415_v35, %v4877_v0  ;;  %v2374_v9 = vpop.f32.mrb[63].mxu0  ;;  %v2417_v24 = vpop.f32.mrb[63].mxu1 }
 0x91b   : > { %v2854_v51 = vmul.f32 -1.442695, %v2421_v12  ;;  %v2425_v52 = vadd.f32 %v2374_v9, %v4878_v3  ;;  %v2427_v28 = vadd.f32 %v2417_v24, %v4879_v58  ;;  %v2856_v26 = vmul.f32 -1.442695, %v2423_v59 }
 0x91c   : > { %3279 = vpow2.f32 %v2853_v40  ;;  %v2857_v23 = vmul.f32 -1.442695, %v2424_v60  ;;  %v2859_v7 = vmul.f32 -1.442695, %v2426_v41 }
 0x91d   : > { %3281 = vpow2.f32 %v2855_v62  ;;  %v2858_v25 = vmul.f32 -1.442695, %v2425_v52  ;;  %v2860_v33 = vmul.f32 -1.442695, %v2427_v28 }
 0x91e   : > { %3283 = vpow2.f32 %v2854_v51 }
 0x91f   : > { %3285 = vpow2.f32 %v2857_v23 }
 0x920   : > { %3287 = vpow2.f32 %v2859_v7 }
 0x921   : > { %3289 = vpow2.f32 %v2858_v25 }
 0x926   : > { %v3280_v19 = vpop.eup %3279 }
 0x927   : > { %v3282_v13 = vpop.eup %3281  ;;  %v2452_v31 = vadd.f32 1.0, %v3280_v19 }
 0x928   : > { %v3284_v15 = vpop.eup %3283  ;;  %v2454_v10 = vadd.f32 1.0, %v3282_v13 }
 0x929   : > { %v2453_v27 = vadd.f32 1.0, %v3284_v15  ;;  %v3286_v32 = vpop.eup %3285 }
 0x92a   : > { %3291 = vrcp.f32 %v2454_v10  ;;  %v3288_v34 = vpop.eup %3287  ;;  %v2456_v29 = vadd.f32 1.0, %v3286_v32 }
 0x92b   : > { %3293 = vpow2.f32 %v2856_v26  ;;  %v3290_v1 = vpop.eup %3289  ;;  %v2458_v8 = vadd.f32 1.0, %v3288_v34 }
 0x92c   : > { %3295 = vrcp.f32 %v2453_v27  ;;  %v2457_v4 = vadd.f32 1.0, %v3290_v1 }
 0x92d   : > { %3297 = vrcp.f32 %v2452_v31 }
 0x92e   : > { %3299 = vrcp.f32 %v2458_v8 }
 0x92f   : > { %3301 = vpow2.f32 %v2860_v33 }
 0x930   : > { %3303 = vrcp.f32 %v2457_v4 }
 0x931   : > { %3305 = vrcp.f32 %v2456_v29 }
 0x934   : > { %v3292_v6 = vpop.eup %3291 }
 0x935   : > { %v3294_v16 = vpop.eup %3293  ;;  %v2476_v11 = vmul.f32 2.0, %v3292_v6 }
 0x936   : > { %v3296_v18 = vpop.eup %3295  ;;  %v2455_v46 = vadd.f32 1.0, %v3294_v16 }
 0x937   : > { %v3298_v22 = vpop.eup %3297  ;;  %v2861_v57 = vadd.f32 -1.0, %v2476_v11  ;;  %v2480_v63 = vmul.f32 %v3296_v18, %v4629_v17 }
 0x938   : > { %v3300_v5 = vpop.eup %3299  ;;  %3307 = vrcp.f32 %v2455_v46 }
 0x939   : > { %v3302_v20 = vpop.eup %3301  ;;  %v2482_v21 = vmul.f32 %v3298_v22, %v2861_v57  ;;  %v2477_v36 = vmul.f32 2.0, %v3300_v5 }
 0x93a   : > { %v3304_v56 = vpop.eup %3303  ;;  %v2459_v42 = vadd.f32 1.0, %v3302_v20 }
 0x93b   : > { %v2484_v37 = vadd.f32 %v2482_v21, %v2480_v63  ;;  %v2862_v2 = vadd.f32 -1.0, %v2477_v36  ;;  %v3306_v39 = vpop.eup %3305  ;;  %v2481_v44 = vmul.f32 %v3304_v56, %v4633_v38 }
 0x93d   : > { %3309 = vtanh.f32 %v2484_v37  ;;  %v2483_v43 = vmul.f32 %v3306_v39, %v2862_v2  ;;  %2492 = vst [vmem:[%s438_s20] sm:$0xff] %v2484_v37 }
 0x93e   : > { %3311 = vrcp.f32 %v2459_v42 }
 0x93f   : > { %v2485_v45 = vadd.f32 %v2483_v43, %v2481_v44 }
 0x941   : > { %3313 = vtanh.f32 %v2485_v45  ;;  %2493 = vst [vmem:[%s438_s20 + $0x8] sm:$0xff] %v2485_v45 }
 0x942   : > { %3472 = shalt.err (!%p3469_p7)
}
 0x943   : > { %s3473_s9 = scalar_lea.hbm %s4653_s8, 256  ;;  %s3477_s29 = scalar_lea.hbm %s4746_s7, 512 }
 0x944   : > { %p3474_p8 = scmp.ne.s32.totalorder %s4653_s8, %s3473_s9  ;;  %p3478_p2 = scmp.lt.u32.totalorder %s4653_s8, %s4746_s7 }
 0x945   : > { %p3479_p10 = scmp.lt.u32.totalorder %s3477_s29, %s3473_s9  ;;  %p3481_p5 = scmp.lt.u32.totalorder %s3473_s9, %s4653_s8 }
 0x946   : > { %p3475_p0 = pnand %p3474_p8, %p4880_p3 }
 0x947   : > { %p3480_p1 = por %p3479_p10, %p3478_p2 }
 0x948   : > { %p3476_p9 = pneg %p3475_p0 }
 0x949   : > { %p3482_p11 = por %p3481_p5, %p3480_p1 }
 0x94b   : > { %p3483_p12 = pnand %p3482_p11, %p3476_p9 }
 0x94d   : > { %3486 = shalt.err (!%p3483_p12)
}
 0x94e   : > { %s3583_s18 = smov 128   ;;  %s3584_s22 = smov 8   ;;  %v3308_v17 = vpop.eup %3307 }
 0x94f   : > { %2898 = dma.vmem_to_hbm [thread:$0]  (%p4880_p3), %s4655_s21, 256, %s4653_s8, %s2500_s19, %s3583_s18, %s3583_s18, %s3584_s22   ;;  %v3310_v38 = vpop.eup %3309 }
 0x950   : > { %v2488_v47 = vmul.f32 %v3310_v38, %v3308_v17  ;;  %s431_s10 = scalar_lea.vmem [#allocation12], %s3871_s23  ;;  %v3312_v48 = vpop.eup %3311  ;;  %s4690_s9 = scalar_lea.hbm %s4745_s6, %s2874_s17 }
 0x951   : > { %s2513_s14 = sshll.u32 %s431_s10, 4  ;;  %v3314_v49 = vpop.eup %3313  ;;  %s2495_s21 = scalar_lea.sflag [#allocation5], %s3855_s16  ;;  %s4692_s14 = int_to_ptr.vmem [resolvable:$true] %s2513_s14 }
 0x952   : > { %2490 = vst [vmem:[%s431_s10] sm:$0xff] %v2488_v47  ;;  %v2489_v61 = vmul.f32 %v3314_v49, %v3312_v48  ;;  %s3487_s8 = scalar_lea.vmem %s4692_s14, 256  ;;  %s3585_s23 = smov [#allocation12]  }
 0x953   : > { %p3488_p6 = scmp.ne.s32.totalorder %s4692_s14, %s3487_s8  ;;  %s3491_s19 = sshll.u32 %s3585_s23, 4  ;;  %s3492_s19 = int_to_ptr.vmem [resolvable:$false] %s3491_s19 }
 0x954   : > { %2491 = vst [vmem:[%s431_s10 + $0x8] sm:$0xff] %v2489_v61  ;;  %s3493_s28 = scalar_lea.vmem %s3492_s19, 512  ;;  %p3494_p8 = scmp.lt.s32.totalorder %s4692_s14, %s3492_s19 }
 0x955   : > { %p3489_p13 = pnand %p3488_p6, %p4880_p3  ;;  %p3495_p0 = scmp.lt.s32.totalorder %s3493_s28, %s3487_s8 }
 0x957   : > { %p3490_p7 = pneg %p3489_p13  ;;  %p3496_p9 = por %p3495_p0, %p3494_p8 }
 0x959   : > { %p3497_p2 = pnand %p3496_p9, %p3490_p7 }
 0x95b   : > { %3500 = shalt.err (!%p3497_p2)
}
 0x95c   : > { %s3501_s17 = scalar_lea.hbm %s4690_s9, 256  ;;  %s3505_s29 = scalar_lea.hbm %s4745_s6, 512 }
 0x95d   : > { %p3502_p10 = scmp.ne.s32.totalorder %s4690_s9, %s3501_s17  ;;  %p3506_p11 = scmp.lt.u32.totalorder %s4690_s9, %s4745_s6 }
 0x95e   : > { %p3507_p12 = scmp.lt.u32.totalorder %s3505_s29, %s3501_s17  ;;  %p3509_p13 = scmp.lt.u32.totalorder %s3501_s17, %s4690_s9 }
 0x95f   : > { %p3503_p1 = pnand %p3502_p10, %p4880_p3 }
 0x960   : > { %p3508_p6 = por %p3507_p12, %p3506_p11 }
 0x961   : > { %p3504_p5 = pneg %p3503_p1 }
 0x962   : > { %p3510_p7 = por %p3509_p13, %p3508_p6 }
 0x964   : > { %p3511_p8 = pnand %p3510_p7, %p3504_p5 }
 0x966   : > { %3514 = shalt.err (!%p3511_p8)
}
 0x967   : > { %2897 = dma.vmem_to_hbm [thread:$0]  (%p4880_p3), %s4692_s14, 256, %s4690_s9, %s2495_s21, %s3583_s18, %s3583_s18, %s3584_s22  }
 0x968 PF: > { %s4881_s10 = sld [smem:[#allocation25_spill]]  ;;  %s2544_s11 = sand.u32 1, %s3553_s24  }
 0x969   : > { %s2545_s15 = scalar_lea.sflag [#allocation5], %s2544_s11 }
 0x96e   : > { %p4882_p0 = scmp.ne.s32.totalorder %s4881_s10, 0 }
 0x970   : > { %p2909_p9 = pnand %p2707_p4, %p4882_p0 }
 0x972   : > { %3544 = dma.done.wait (!%p2909_p9), %s2545_s15, 256  }
 0x973   : > { %3546 = vsyncadd (!%p2909_p9), %s2545_s15, 4294967040  ;;  %s2554_s13 = scalar_lea.sflag [#allocation14], %s2544_s11 }
 0x974   : > { %3548 = dma.done.wait (!%p2909_p9), %s2554_s13, 256  }
 0x975   : > { %3550 = vsyncadd (!%p2909_p9), %s2554_s13, 4294967040  ;;  %s4883_s27 = sld [smem:[#allocation23_spill]]  ;;  %s4884_s16 = sld [smem:[#allocation24_spill]] }
 0x976   : > { %s4885_s24 = smov %s3557_s25  ;;  %s4886_s25 = smov %s3561_s26 }
 0x97b   : > { %p28_p3 = scmp.ge.s32.totalorder %s4883_s27, 4   ;;  %s4887_s26 = smov %s4884_s16 }
 0x97d   :  { %30 = sbr.rel (!%p28_p3) target bundleno = 12 (0xc), region = 151 }
 0x984   :  { %2559 = vsyncpa [#allocation4], 1 }
 0x985   :  { %2561 = vsyncpa [#allocation4 + $0x1], 1 }
 0x986   :  { %2562 = vsyncpa [#allocation7], 1 }
 0x987   :  { %2563 = vsyncpa [#allocation10], 1 }
 0x988   :  { %2565 = vsyncpa [#allocation10 + $0x1], 1 }
 0x989   :  { %2566 = vsyncpa [#allocation5], 1 }
 0x98a   :  { %2568 = vsyncpa [#allocation5 + $0x1], 1 }
 0x98b   :  { %2569 = vsyncpa [#allocation14], 1 }
 0x98c   :  { %2571 = vsyncpa [#allocation14 + $0x1], 1 }

</bundles_post_ra>
